<compile_context>
chip_gen: v5e
topology: v5e:2x2
jax: 0.10.0
libtpu: 0.0.40
codegen_flags: <defaults>
</compile_context>

<pallas_src>
import functools

import jax
import jax.numpy as jnp
from jax.experimental import pallas as pl
from jax.experimental.pallas import tpu as pltpu

NEG_SLOPE = 0.01  # PyTorch nn.LeakyReLU default
HIDDEN_DIMS = (256, 384, 384, 256, 256)
LANE = 128


def _round_up(x, m):
    return ((x + m - 1) // m) * m


def _leaky_relu(x):
    # max(x, 0.01*x) == LeakyReLU(0.01): mul + max on the VPU.
    return jnp.maximum(x, NEG_SLOPE * x)


def mpnet1_kernel(
    x_ref,
    w1_ref, b1_ref,
    w2_ref, b2_ref,
    w3_ref, b3_ref,
    w4_ref, b4_ref,
    w5_ref, b5_ref,
    w6_ref, b6_ref,
    o_ref,
):
    # x is f32 [TB, K_pad]; cast to bf16 once in-kernel. Weights bf16,
    # biases f32, accumulate f32 on the MXU.
    def layer(h_bf16, w_ref, b_ref, activate):
        acc = jnp.dot(h_bf16, w_ref[...], preferred_element_type=jnp.float32)
        acc = acc + b_ref[...]
        if activate:
            acc = _leaky_relu(acc)
        return acc

    h = x_ref[...].astype(jnp.bfloat16)
    h = layer(h, w1_ref, b1_ref, True).astype(jnp.bfloat16)
    h = layer(h, w2_ref, b2_ref, True).astype(jnp.bfloat16)
    h = layer(h, w3_ref, b3_ref, True).astype(jnp.bfloat16)
    h = layer(h, w4_ref, b4_ref, True).astype(jnp.bfloat16)
    h = layer(h, w5_ref, b5_ref, True).astype(jnp.bfloat16)
    h = layer(h, w6_ref, b6_ref, False)  # final layer: no activation, f32
    o_ref[...] = h.astype(o_ref.dtype)


def prepare_params(params):
    """One-time (outside-jit) device prep of f32 params [(W [in,out], b [1,out])].

    bf16 weights, f32 biases, first layer's K dim and last layer's N dim
    zero-padded to a multiple of 128 lanes.
    """
    prepped = []
    n = len(params)
    for i, (w, b) in enumerate(params):
        w = jnp.asarray(w, jnp.float32)
        b = jnp.asarray(b, jnp.float32).reshape(1, -1)
        if i == 0:
            k_pad = _round_up(w.shape[0], LANE) - w.shape[0]
            if k_pad:
                w = jnp.pad(w, ((0, k_pad), (0, 0)))
        if i == n - 1:
            n_pad = _round_up(w.shape[1], LANE) - w.shape[1]
            if n_pad:
                w = jnp.pad(w, ((0, 0), (0, n_pad)))
                b = jnp.pad(b, ((0, 0), (0, n_pad)))
        prepped.append((w.astype(jnp.bfloat16), b))
    return prepped


def _pick_tile(batch, block_batch):
    # Batch tile selection (batch / block_batch are trace-time Python ints):
    #  * large batches  -> block_batch (default 1024) rows per step to amortize
    #    the ~0.35 us/step pipeline overhead on v6e/v7x (grid >= 2 steps).
    #  * mid-size       -> exactly 2 steps so the "parallel" axis uses both
    #    v7x TensorCores.
    #  * small / RL     -> single step, rounded to 16 (bf16 sublane tile).
    if batch >= 2 * block_batch:
        return block_batch
    if batch > 512:
        return _round_up(pl.cdiv(batch, 2), 256)
    return _round_up(batch, 16)


@functools.partial(jax.jit, static_argnames=("action_dim", "block_batch"))
def mpnet1_forward(state, prepped_params, action_dim, block_batch=1024):
    """state: [batch, state_dim] f32. prepped_params: from prepare_params()."""
    batch, state_dim = state.shape
    padded_state_dim = prepped_params[0][0].shape[0]
    padded_action_dim = prepped_params[-1][0].shape[1]

    tb = _pick_tile(batch, block_batch)
    padded_batch = _round_up(batch, tb)

    pad_r = padded_batch - batch
    pad_c = padded_state_dim - state_dim
    x = state
    if pad_r or pad_c:
        x = jnp.pad(x, ((0, pad_r), (0, pad_c)))

    flat_args = [x]
    in_specs = [pl.BlockSpec((tb, padded_state_dim), lambda i: (i, 0))]
    for (w, b) in prepped_params:
        flat_args.append(w)
        flat_args.append(b)
        # Constant index_map -> weights/biases stay VMEM-resident across steps.
        in_specs.append(pl.BlockSpec(w.shape, lambda i: (0, 0)))
        in_specs.append(pl.BlockSpec(b.shape, lambda i: (0, 0)))

    dims = [padded_state_dim] + [w.shape[1] for (w, _) in prepped_params]
    flops = 2 * padded_batch * sum(dims[i] * dims[i + 1] for i in range(len(dims) - 1))
    bytes_accessed = (
        sum(w.size * 2 + b.size * 4 for (w, b) in prepped_params)  # bf16 W + f32 b
        + padded_batch * padded_state_dim * 4                       # f32 input
        + padded_batch * padded_action_dim * 4                      # f32 output
    )

    out = pl.pallas_call(
        mpnet1_kernel,
        out_shape=jax.ShapeDtypeStruct((padded_batch, padded_action_dim), jnp.float32),
        grid=(padded_batch // tb,),
        in_specs=in_specs,
        out_specs=pl.BlockSpec((tb, padded_action_dim), lambda i: (i, 0)),
        compiler_params=pltpu.CompilerParams(
            dimension_semantics=("parallel",),   # megacore split on v7x
            vmem_limit_bytes=(32 << 20) if tb >= 2048 else (16 << 20),
        ),
        cost_estimate=pl.CostEstimate(
            flops=flops, transcendentals=0, bytes_accessed=bytes_accessed),
    )(*flat_args)

    return out[:batch, :action_dim]


def init_params(key, state_dim, action_dim):
    """Synthetic init matching PyTorch Linear shapes.

    PyTorch stores weight as [out, in]; we store its transpose [in, out] so the
    kernel computes x @ W directly. Init mimics uniform(-1/sqrt(in), 1/sqrt(in)).
    """
    dims = [state_dim, *HIDDEN_DIMS, action_dim]
    params = []
    for i in range(len(dims) - 1):
        fan_in, fan_out = dims[i], dims[i + 1]
        key, kw, kb = jax.random.split(key, 3)
        bound = 1.0 / jnp.sqrt(jnp.float32(fan_in))
        w = jax.random.uniform(kw, (fan_in, fan_out), jnp.float32, -bound, bound)
        b = jax.random.uniform(kb, (1, fan_out), jnp.float32, -bound, bound)
        params.append((w, b))
    return params


def mpnet1_reference(state, params):
    """Pure-JAX reference mirroring the kernel's bf16-operand / f32-accumulate path."""
    h = state.astype(jnp.bfloat16)
    n = len(params)
    for i, (w, b) in enumerate(params):
        acc = jnp.dot(h, w.astype(jnp.bfloat16),
                      preferred_element_type=jnp.float32) + b
        if i < n - 1:
            acc = jnp.maximum(acc, NEG_SLOPE * acc)
            h = acc.astype(jnp.bfloat16)
        else:
            h = acc
    return h


if __name__ == "__main__":
    key = jax.random.PRNGKey(0)
    k_params, k_state = jax.random.split(key)

    batch = 2
    state_dim = 32
    action_dim = 8

    params = init_params(k_params, state_dim, action_dim)
    prepped = prepare_params(params)          # one-time: bf16 + lane padding
    state = jax.random.normal(k_state, (batch, state_dim), dtype=jnp.float32)

    out = mpnet1_forward(state, prepped, action_dim=action_dim)
    out = jax.block_until_ready(out)

    ref = mpnet1_reference(state, params)
    assert out.shape == (batch, action_dim), out.shape
    assert jnp.allclose(out, ref, atol=1e-2, rtol=1e-2), (
        f"max abs err = {jnp.max(jnp.abs(out - ref))}"
    )

    print("KERNEL_OK")
</pallas_src>

<mosaic_0001>
module attributes {stable_mosaic.version = 11 : i64} {
  func.func @mpnet1_kernel(%arg0: i32, %arg1: memref<16x128xf32, #tpu.memory_space<vmem>>, %arg2: memref<128x256xbf16, #tpu.memory_space<vmem>>, %arg3: memref<1x256xf32, #tpu.memory_space<vmem>>, %arg4: memref<256x384xbf16, #tpu.memory_space<vmem>>, %arg5: memref<1x384xf32, #tpu.memory_space<vmem>>, %arg6: memref<384x384xbf16, #tpu.memory_space<vmem>>, %arg7: memref<1x384xf32, #tpu.memory_space<vmem>>, %arg8: memref<384x256xbf16, #tpu.memory_space<vmem>>, %arg9: memref<1x256xf32, #tpu.memory_space<vmem>>, %arg10: memref<256x256xbf16, #tpu.memory_space<vmem>>, %arg11: memref<1x256xf32, #tpu.memory_space<vmem>>, %arg12: memref<256x128xbf16, #tpu.memory_space<vmem>>, %arg13: memref<1x128xf32, #tpu.memory_space<vmem>>, %arg14: memref<16x128xf32, #tpu.memory_space<vmem>>) attributes {dimension_semantics = [#tpu.dimension_semantics<parallel>], iteration_bounds = array<i64: 1>, scalar_prefetch = 0 : i64, scratch_operands = 0 : i64, tpu.core_type = #tpu.core_type<tc>, window_params = [{transform_indices = @transform_0, window_bounds = array<i64: 16, 128>}, {pipeline_mode = #tpu.pipeline_mode<synchronous>, transform_indices = @transform_1, window_bounds = array<i64: 128, 256>}, {pipeline_mode = #tpu.pipeline_mode<synchronous>, transform_indices = @transform_2, window_bounds = array<i64: 1, 256>}, {pipeline_mode = #tpu.pipeline_mode<synchronous>, transform_indices = @transform_3, window_bounds = array<i64: 256, 384>}, {pipeline_mode = #tpu.pipeline_mode<synchronous>, transform_indices = @transform_4, window_bounds = array<i64: 1, 384>}, {pipeline_mode = #tpu.pipeline_mode<synchronous>, transform_indices = @transform_5, window_bounds = array<i64: 384, 384>}, {pipeline_mode = #tpu.pipeline_mode<synchronous>, transform_indices = @transform_6, window_bounds = array<i64: 1, 384>}, {pipeline_mode = #tpu.pipeline_mode<synchronous>, transform_indices = @transform_7, window_bounds = array<i64: 384, 256>}, {pipeline_mode = #tpu.pipeline_mode<synchronous>, transform_indices = @transform_8, window_bounds = array<i64: 1, 256>}, {pipeline_mode = #tpu.pipeline_mode<synchronous>, transform_indices = @transform_9, window_bounds = array<i64: 256, 256>}, {pipeline_mode = #tpu.pipeline_mode<synchronous>, transform_indices = @transform_10, window_bounds = array<i64: 1, 256>}, {pipeline_mode = #tpu.pipeline_mode<synchronous>, transform_indices = @transform_11, window_bounds = array<i64: 256, 128>}, {pipeline_mode = #tpu.pipeline_mode<synchronous>, transform_indices = @transform_12, window_bounds = array<i64: 1, 128>}, {transform_indices = @transform_13, window_bounds = array<i64: 16, 128>}]} {
    %c0 = arith.constant 0 : index
    %c0_0 = arith.constant 0 : index
    %0 = vector.load %arg1[%c0, %c0_0] : memref<16x128xf32, #tpu.memory_space<vmem>>, vector<16x128xf32>
    %1 = arith.truncf %0 : vector<16x128xf32> to vector<16x128xbf16>
    %c0_1 = arith.constant 0 : index
    %c0_2 = arith.constant 0 : index
    %2 = vector.load %arg2[%c0_1, %c0_2] : memref<128x256xbf16, #tpu.memory_space<vmem>>, vector<128x256xbf16>
    %cst = arith.constant dense<0.000000e+00> : vector<16x256xf32>
    %3 = tpu.matmul %1, %2, %cst {dimension_numbers = #tpu.dot_dimension_numbers<[1], [0], [0], [1], [0, 0, 1, 1], [], []>} : vector<16x128xbf16>, vector<128x256xbf16>, vector<16x256xf32> -> vector<16x256xf32>
    %c0_3 = arith.constant 0 : index
    %c0_4 = arith.constant 0 : index
    %4 = vector.load %arg3[%c0_3, %c0_4] : memref<1x256xf32, #tpu.memory_space<vmem>>, vector<1x256xf32>
    %5 = vector.broadcast %4 : vector<1x256xf32> to vector<16x256xf32>
    %6 = arith.addf %3, %5 : vector<16x256xf32>
    %cst_5 = arith.constant 0.00999999977 : f32
    %7 = vector.broadcast %cst_5 : f32 to vector<16x256xf32>
    %8 = arith.mulf %7, %6 : vector<16x256xf32>
    %9 = arith.maximumf %6, %8 : vector<16x256xf32>
    %10 = arith.truncf %9 : vector<16x256xf32> to vector<16x256xbf16>
    %c0_6 = arith.constant 0 : index
    %c0_7 = arith.constant 0 : index
    %11 = vector.load %arg4[%c0_6, %c0_7] : memref<256x384xbf16, #tpu.memory_space<vmem>>, vector<256x384xbf16>
    %cst_8 = arith.constant dense<0.000000e+00> : vector<16x384xf32>
    %12 = tpu.matmul %10, %11, %cst_8 {dimension_numbers = #tpu.dot_dimension_numbers<[1], [0], [0], [1], [0, 0, 1, 1], [], []>} : vector<16x256xbf16>, vector<256x384xbf16>, vector<16x384xf32> -> vector<16x384xf32>
    %c0_9 = arith.constant 0 : index
    %c0_10 = arith.constant 0 : index
    %13 = vector.load %arg5[%c0_9, %c0_10] : memref<1x384xf32, #tpu.memory_space<vmem>>, vector<1x384xf32>
    %14 = vector.broadcast %13 : vector<1x384xf32> to vector<16x384xf32>
    %15 = arith.addf %12, %14 : vector<16x384xf32>
    %cst_11 = arith.constant 0.00999999977 : f32
    %16 = vector.broadcast %cst_11 : f32 to vector<16x384xf32>
    %17 = arith.mulf %16, %15 : vector<16x384xf32>
    %18 = arith.maximumf %15, %17 : vector<16x384xf32>
    %19 = arith.truncf %18 : vector<16x384xf32> to vector<16x384xbf16>
    %c0_12 = arith.constant 0 : index
    %c0_13 = arith.constant 0 : index
    %20 = vector.load %arg6[%c0_12, %c0_13] : memref<384x384xbf16, #tpu.memory_space<vmem>>, vector<384x384xbf16>
    %cst_14 = arith.constant dense<0.000000e+00> : vector<16x384xf32>
    %21 = tpu.matmul %19, %20, %cst_14 {dimension_numbers = #tpu.dot_dimension_numbers<[1], [0], [0], [1], [0, 0, 1, 1], [], []>} : vector<16x384xbf16>, vector<384x384xbf16>, vector<16x384xf32> -> vector<16x384xf32>
    %c0_15 = arith.constant 0 : index
    %c0_16 = arith.constant 0 : index
    %22 = vector.load %arg7[%c0_15, %c0_16] : memref<1x384xf32, #tpu.memory_space<vmem>>, vector<1x384xf32>
    %23 = vector.broadcast %22 : vector<1x384xf32> to vector<16x384xf32>
    %24 = arith.addf %21, %23 : vector<16x384xf32>
    %cst_17 = arith.constant 0.00999999977 : f32
    %25 = vector.broadcast %cst_17 : f32 to vector<16x384xf32>
    %26 = arith.mulf %25, %24 : vector<16x384xf32>
    %27 = arith.maximumf %24, %26 : vector<16x384xf32>
    %28 = arith.truncf %27 : vector<16x384xf32> to vector<16x384xbf16>
    %c0_18 = arith.constant 0 : index
    %c0_19 = arith.constant 0 : index
    %29 = vector.load %arg8[%c0_18, %c0_19] : memref<384x256xbf16, #tpu.memory_space<vmem>>, vector<384x256xbf16>
    %cst_20 = arith.constant dense<0.000000e+00> : vector<16x256xf32>
    %30 = tpu.matmul %28, %29, %cst_20 {dimension_numbers = #tpu.dot_dimension_numbers<[1], [0], [0], [1], [0, 0, 1, 1], [], []>} : vector<16x384xbf16>, vector<384x256xbf16>, vector<16x256xf32> -> vector<16x256xf32>
    %c0_21 = arith.constant 0 : index
    %c0_22 = arith.constant 0 : index
    %31 = vector.load %arg9[%c0_21, %c0_22] : memref<1x256xf32, #tpu.memory_space<vmem>>, vector<1x256xf32>
    %32 = vector.broadcast %31 : vector<1x256xf32> to vector<16x256xf32>
    %33 = arith.addf %30, %32 : vector<16x256xf32>
    %cst_23 = arith.constant 0.00999999977 : f32
    %34 = vector.broadcast %cst_23 : f32 to vector<16x256xf32>
    %35 = arith.mulf %34, %33 : vector<16x256xf32>
    %36 = arith.maximumf %33, %35 : vector<16x256xf32>
    %37 = arith.truncf %36 : vector<16x256xf32> to vector<16x256xbf16>
    %c0_24 = arith.constant 0 : index
    %c0_25 = arith.constant 0 : index
    %38 = vector.load %arg10[%c0_24, %c0_25] : memref<256x256xbf16, #tpu.memory_space<vmem>>, vector<256x256xbf16>
    %cst_26 = arith.constant dense<0.000000e+00> : vector<16x256xf32>
    %39 = tpu.matmul %37, %38, %cst_26 {dimension_numbers = #tpu.dot_dimension_numbers<[1], [0], [0], [1], [0, 0, 1, 1], [], []>} : vector<16x256xbf16>, vector<256x256xbf16>, vector<16x256xf32> -> vector<16x256xf32>
    %c0_27 = arith.constant 0 : index
    %c0_28 = arith.constant 0 : index
    %40 = vector.load %arg11[%c0_27, %c0_28] : memref<1x256xf32, #tpu.memory_space<vmem>>, vector<1x256xf32>
    %41 = vector.broadcast %40 : vector<1x256xf32> to vector<16x256xf32>
    %42 = arith.addf %39, %41 : vector<16x256xf32>
    %cst_29 = arith.constant 0.00999999977 : f32
    %43 = vector.broadcast %cst_29 : f32 to vector<16x256xf32>
    %44 = arith.mulf %43, %42 : vector<16x256xf32>
    %45 = arith.maximumf %42, %44 : vector<16x256xf32>
    %46 = arith.truncf %45 : vector<16x256xf32> to vector<16x256xbf16>
    %c0_30 = arith.constant 0 : index
    %c0_31 = arith.constant 0 : index
    %47 = vector.load %arg12[%c0_30, %c0_31] : memref<256x128xbf16, #tpu.memory_space<vmem>>, vector<256x128xbf16>
    %cst_32 = arith.constant dense<0.000000e+00> : vector<16x128xf32>
    %48 = tpu.matmul %46, %47, %cst_32 {dimension_numbers = #tpu.dot_dimension_numbers<[1], [0], [0], [1], [0, 0, 1, 1], [], []>} : vector<16x256xbf16>, vector<256x128xbf16>, vector<16x128xf32> -> vector<16x128xf32>
    %c0_33 = arith.constant 0 : index
    %c0_34 = arith.constant 0 : index
    %49 = vector.load %arg13[%c0_33, %c0_34] : memref<1x128xf32, #tpu.memory_space<vmem>>, vector<1x128xf32>
    %50 = vector.broadcast %49 : vector<1x128xf32> to vector<16x128xf32>
    %51 = arith.addf %48, %50 : vector<16x128xf32>
    %c0_35 = arith.constant 0 : index
    %c0_36 = arith.constant 0 : index
    %52 = vector.load %arg14[%c0_35, %c0_36] : memref<16x128xf32, #tpu.memory_space<vmem>>, vector<16x128xf32>
    tpu.vector_store %arg14[%c0_35, %c0_36], %51 {strides = array<i32>} : memref<16x128xf32, #tpu.memory_space<vmem>>, vector<16x128xf32>,
    return
  }
  func.func @transform_0(%arg0: i32) -> (i32, i32) {
    %c0_i32 = arith.constant 0 : i32
    %c0_i32_0 = arith.constant 0 : i32
    return %arg0, %c0_i32 : i32, i32
  }
  func.func @transform_1(%arg0: i32) -> (i32, i32) {
    %c0_i32 = arith.constant 0 : i32
    %c0_i32_0 = arith.constant 0 : i32
    %c0_i32_1 = arith.constant 0 : i32
    return %c0_i32, %c0_i32_0 : i32, i32
  }
  func.func @transform_2(%arg0: i32) -> (i32, i32) {
    %c0_i32 = arith.constant 0 : i32
    %c0_i32_0 = arith.constant 0 : i32
    %c0_i32_1 = arith.constant 0 : i32
    return %c0_i32, %c0_i32_0 : i32, i32
  }
  func.func @transform_3(%arg0: i32) -> (i32, i32) {
    %c0_i32 = arith.constant 0 : i32
    %c0_i32_0 = arith.constant 0 : i32
    %c0_i32_1 = arith.constant 0 : i32
    return %c0_i32, %c0_i32_0 : i32, i32
  }
  func.func @transform_4(%arg0: i32) -> (i32, i32) {
    %c0_i32 = arith.constant 0 : i32
    %c0_i32_0 = arith.constant 0 : i32
    %c0_i32_1 = arith.constant 0 : i32
    return %c0_i32, %c0_i32_0 : i32, i32
  }
  func.func @transform_5(%arg0: i32) -> (i32, i32) {
    %c0_i32 = arith.constant 0 : i32
    %c0_i32_0 = arith.constant 0 : i32
    %c0_i32_1 = arith.constant 0 : i32
    return %c0_i32, %c0_i32_0 : i32, i32
  }
  func.func @transform_6(%arg0: i32) -> (i32, i32) {
    %c0_i32 = arith.constant 0 : i32
    %c0_i32_0 = arith.constant 0 : i32
    %c0_i32_1 = arith.constant 0 : i32
    return %c0_i32, %c0_i32_0 : i32, i32
  }
  func.func @transform_7(%arg0: i32) -> (i32, i32) {
    %c0_i32 = arith.constant 0 : i32
    %c0_i32_0 = arith.constant 0 : i32
    %c0_i32_1 = arith.constant 0 : i32
    return %c0_i32, %c0_i32_0 : i32, i32
  }
  func.func @transform_8(%arg0: i32) -> (i32, i32) {
    %c0_i32 = arith.constant 0 : i32
    %c0_i32_0 = arith.constant 0 : i32
    %c0_i32_1 = arith.constant 0 : i32
    return %c0_i32, %c0_i32_0 : i32, i32
  }
  func.func @transform_9(%arg0: i32) -> (i32, i32) {
    %c0_i32 = arith.constant 0 : i32
    %c0_i32_0 = arith.constant 0 : i32
    %c0_i32_1 = arith.constant 0 : i32
    return %c0_i32, %c0_i32_0 : i32, i32
  }
  func.func @transform_10(%arg0: i32) -> (i32, i32) {
    %c0_i32 = arith.constant 0 : i32
    %c0_i32_0 = arith.constant 0 : i32
    %c0_i32_1 = arith.constant 0 : i32
    return %c0_i32, %c0_i32_0 : i32, i32
  }
  func.func @transform_11(%arg0: i32) -> (i32, i32) {
    %c0_i32 = arith.constant 0 : i32
    %c0_i32_0 = arith.constant 0 : i32
    %c0_i32_1 = arith.constant 0 : i32
    return %c0_i32, %c0_i32_0 : i32, i32
  }
  func.func @transform_12(%arg0: i32) -> (i32, i32) {
    %c0_i32 = arith.constant 0 : i32
    %c0_i32_0 = arith.constant 0 : i32
    %c0_i32_1 = arith.constant 0 : i32
    return %c0_i32, %c0_i32_0 : i32, i32
  }
  func.func @transform_13(%arg0: i32) -> (i32, i32) {
    %c0_i32 = arith.constant 0 : i32
    %c0_i32_0 = arith.constant 0 : i32
    return %arg0, %c0_i32 : i32, i32
  }
}

</mosaic_0001>

<bundles_post_ra>
// kernel: mpnet1_forward.1
= control target key start
LH: loop header
LB: loop body
LE: loop exit
PB: predicated region body
PF: predicated region fallthrough
CT: control target
= control target key end

     0   :  { %18 = vsyncpa [#allocation3], 0  ;;  %s3636_s0 = inlined_call_operand.vmem [shape: f32[16,128], index: 0, kind: input, shape index: {}]   ;;  %s3637_s1 = inlined_call_operand.hbm [shape: bf16[128,256], index: 1, kind: input, shape index: {}]   ;;  %s3638_s2 = inlined_call_operand.vmem [shape: f32[1,256], index: 2, kind: input, shape index: {}]   ;;  %s3639_s3 = inlined_call_operand.hbm [shape: bf16[256,384], index: 3, kind: input, shape index: {}]   ;;  %s3640_s4 = inlined_call_operand.vmem [shape: f32[1,384], index: 4, kind: input, shape index: {}]   ;;  %s3641_s5 = inlined_call_operand.hbm [shape: bf16[384,384], index: 5, kind: input, shape index: {}]   ;;  %s3642_s6 = inlined_call_operand.vmem [shape: f32[1,384], index: 6, kind: input, shape index: {}]   ;;  %s3643_s7 = inlined_call_operand.hbm [shape: bf16[384,256], index: 7, kind: input, shape index: {}]   ;;  %s3644_s8 = inlined_call_operand.vmem [shape: f32[1,256], index: 8, kind: input, shape index: {}]   ;;  %s3645_s9 = inlined_call_operand.hbm [shape: bf16[256,256], index: 9, kind: input, shape index: {}]   ;;  %s3646_s10 = inlined_call_operand.vmem [shape: f32[1,256], index: 10, kind: input, shape index: {}]   ;;  %s3647_s11 = inlined_call_operand.hbm [shape: bf16[256,128], index: 11, kind: input, shape index: {}]   ;;  %s3648_s12 = inlined_call_operand.vmem [shape: f32[1,128], index: 12, kind: input, shape index: {}]   ;;  %s3649_s13 = inlined_call_operand.vmem [shape: f32[16,128], index: 13, kind: output, shape index: {}]  }
   0x1   :  { %19 = vsyncpa [#allocation5], 0 }
   0x2   :  { %20 = vsyncpa [#allocation8], 0  ;;  %s43_s27 = sshll.u32 %s3639_s3, 4  ;;  %s44_s27 = int_to_ptr.hbm [resolvable:$true] %s43_s27 }
   0x3   :  { %21 = vsyncpa [#allocation11], 0  ;;  %s3484_s28 = smov [#allocation4]   ;;  %s3485_s30 = smov 192  }
   0x4   :  { %s45_s29 = sshll.u32 %s3484_s28, 4  ;;  %s3486_s14 = smov 12   ;;  %s46_s29 = int_to_ptr.vmem [resolvable:$true] %s45_s29 }
   0x5   :  { %51 = dma.hbm_to_vmem [thread:$0]  %s44_s27, 6144, %s46_s29, [#allocation5], %s3485_s30, %s3485_s30, %s3486_s14  }
   0x6   :  { %s73_s17 = sshll.u32 %s3643_s7, 4  ;;  %s3487_s18 = smov [#allocation7]   ;;  %s74_s17 = int_to_ptr.hbm [resolvable:$true] %s73_s17 }
   0x7   :  { %s75_s19 = sshll.u32 %s3487_s18, 4  ;;  %s28_s22 = sshll.u32 %s3637_s1, 4  ;;  %s76_s19 = int_to_ptr.vmem [resolvable:$true] %s75_s19  ;;  %s29_s22 = int_to_ptr.hbm [resolvable:$true] %s28_s22 }
   0x8   :  { %s3488_s3 = smov 128   ;;  %s3489_s23 = smov 8  }
   0x9   :  { %81 = dma.hbm_to_vmem [thread:$0]  %s74_s17, 6144, %s76_s19, [#allocation8], %s3488_s3, %s3488_s3, %s3489_s23  }
   0xa   :  { %s58_s26 = sshll.u32 %s3641_s5, 4  ;;  %s3490_s27 = smov [#allocation2]   ;;  %s59_s26 = int_to_ptr.hbm [resolvable:$true] %s58_s26 }
   0xb   :  { %s30_s28 = sshll.u32 %s3490_s27, 4  ;;  %s3491_s7 = smov [#allocation6]   ;;  %s31_s28 = int_to_ptr.vmem [resolvable:$true] %s30_s28 }
   0xc   :  { %36 = dma.hbm_to_vmem [thread:$0]  %s29_s22, 2048, %s31_s28, [#allocation3], %s3488_s3, %s3488_s3, %s3489_s23  }
   0xd   :  { %s60_s29 = sshll.u32 %s3491_s7, 4  ;;  %s88_s1 = sshll.u32 %s3645_s9, 4  ;;  %s61_s29 = int_to_ptr.vmem [resolvable:$true] %s60_s29  ;;  %s89_s1 = int_to_ptr.hbm [resolvable:$true] %s88_s1 }
   0xe   :  { %66 = dma.hbm_to_vmem [thread:$0]  %s59_s26, 9216, %s61_s29, [#allocation5], %s3485_s30, %s3485_s30, %s3486_s14  }
   0xf   :  { %s103_s19 = sshll.u32 %s3647_s11, 4  ;;  %s3492_s20 = smov [#allocation9]   ;;  %s104_s19 = int_to_ptr.hbm [resolvable:$true] %s103_s19 }
  0x10   :  { %s90_s5 = sshll.u32 %s3492_s20, 4  ;;  %s3493_s21 = smov [#allocation10]   ;;  %s91_s5 = int_to_ptr.vmem [resolvable:$true] %s90_s5 }
  0x11   :  { %96 = dma.hbm_to_vmem [thread:$0]  %s89_s1, 4096, %s91_s5, [#allocation8], %s3488_s3, %s3488_s3, %s3489_s23  }
  0x12   :  { %s105_s22 = sshll.u32 %s3493_s21, 4  ;;  %s3494_s24 = smov 64   ;;  %s106_s22 = int_to_ptr.vmem [resolvable:$true] %s105_s22 }
  0x13   :  { %s3495_s25 = smov 4  }
  0x14   :  { %111 = dma.hbm_to_vmem [thread:$0]  %s104_s19, 2048, %s106_s22, [#allocation11], %s3494_s24, %s3494_s24, %s3495_s25  }
  0x15   :  { %3476 = dma.done.wait [#allocation3], 2048  }
  0x16   :  { %3477 = vsyncadd [#allocation3], 4294965248 }
  0x17   :  { %3478 = dma.done.wait [#allocation5], 15360  }
  0x18   :  { %3479 = vsyncadd [#allocation5], 4294951936 }
  0x19   :  { %3480 = dma.done.wait [#allocation8], 10240  }
  0x1a   :  { %3481 = vsyncadd [#allocation8], 4294957056 }
  0x1b   :  { %3482 = dma.done.wait [#allocation11], 2048  }
  0x1c   :  { %3483 = vsyncadd [#allocation11], 4294965248  ;;  %v2217_v0 = vld [vmem:[#allocation2 + $0x70] sm:$0xf]  ;;  %v3102_v1 = vld [vmem:[#allocation2 + $0x74] sm:$0xf0] }
  0x1d   :  { %v3101_v2 = vld [vmem:[#allocation2 + $0x74] sm:$0xf]  ;;  %v2218_v3 = vor.u32 %v3102_v1, %v2217_v0  ;;  %v2219_v4 = vld [vmem:[#allocation2 + $0x78] sm:$0xf0]  ;;  %v2209_v5 = vld [vmem:[#allocation2 + $0x60] sm:$0xf] }
  0x1e   :  { %v3100_v6 = vld [vmem:[#allocation2 + $0x64] sm:$0xf0]  ;;  %v2222_v7 = vor.u32 %v3101_v2, %v2219_v4  ;;  %v3099_v8 = vld [vmem:[#allocation2 + $0x64] sm:$0xf]  ;;  %v2211_v9 = vld [vmem:[#allocation2 + $0x68] sm:$0xf0] }
  0x1f   :  { %243 = vmatpush.bf16.msra.mxu0 %v2218_v3  ;;  %v2210_v10 = vor.u32 %v3100_v6, %v2209_v5  ;;  %v2214_v11 = vor.u32 %v3099_v8, %v2211_v9  ;;  %v2201_v12 = vld [vmem:[#allocation2 + $0x50] sm:$0xf]  ;;  %v3098_v13 = vld [vmem:[#allocation2 + $0x54] sm:$0xf0]  ;;  %v3097_v14 = vld [vmem:[#allocation2 + $0x54] sm:$0xf] }
  0x20   :  { %257 = vmatpush.bf16.msra.mxu1 %v2222_v7  ;;  %v2203_v15 = vld [vmem:[#allocation2 + $0x58] sm:$0xf0]  ;;  %v2202_v16 = vor.u32 %v3098_v13, %v2201_v12  ;;  %v2193_v18 = vld [vmem:[#allocation2 + $0x40] sm:$0xf]  ;;  %v3096_v19 = vld [vmem:[#allocation2 + $0x44] sm:$0xf0] }
  0x21   :  { %v2206_v17 = vor.u32 %v3097_v14, %v2203_v15  ;;  %v3095_v20 = vld [vmem:[#allocation2 + $0x44] sm:$0xf]  ;;  %v2195_v21 = vld [vmem:[#allocation2 + $0x48] sm:$0xf0]  ;;  %v2185_v22 = vld [vmem:[#allocation2 + $0x30] sm:$0xf]  ;;  %v2194_v24 = vor.u32 %v3096_v19, %v2193_v18 }
  0x22   :  { %v3094_v23 = vld [vmem:[#allocation2 + $0x34] sm:$0xf0]  ;;  %v3093_v25 = vld [vmem:[#allocation2 + $0x34] sm:$0xf]  ;;  %v2187_v26 = vld [vmem:[#allocation2 + $0x38] sm:$0xf0]  ;;  %v2198_v29 = vor.u32 %v3095_v20, %v2195_v21 }
  0x23   :  { %244 = vmatpush.bf16.msra.mxu0 %v2210_v10  ;;  %v2309_v27 = vld [vmem:[#allocation4 + $0xa8] sm:$0xf]  ;;  %v3125_v28 = vld [vmem:[#allocation4 + $0xb0] sm:$0xf0]  ;;  %v2297_v33 = vld [vmem:[#allocation4 + $0x90] sm:$0xf]  ;;  %v2186_v39 = vor.u32 %v3094_v23, %v2185_v22  ;;  %v2190_v44 = vor.u32 %v3093_v25, %v2187_v26 }
  0x24   :  { %258 = vmatpush.bf16.msra.mxu1 %v2214_v11  ;;  %v2310_v30 = vor.u32 %v3125_v28, %v2309_v27  ;;  %v2405_v31 = vld [vmem:[#allocation4 + $0x168] sm:$0xf]  ;;  %v3149_v32 = vld [vmem:[#allocation4 + $0x170] sm:$0xf0]  ;;  %v3122_v35 = vld [vmem:[#allocation4 + $0x98] sm:$0xf0] }
  0x25   :  { %v2406_v34 = vor.u32 %v3149_v32, %v2405_v31  ;;  %v2393_v36 = vld [vmem:[#allocation4 + $0x150] sm:$0xf]  ;;  %v3146_v37 = vld [vmem:[#allocation4 + $0x158] sm:$0xf0]  ;;  %v2298_v38 = vor.u32 %v3122_v35, %v2297_v33  ;;  %v2177_v40 = vld [vmem:[#allocation2 + $0x20] sm:$0xf] }
  0x26   :  { %609 = vmatpush.bf16.msra.mxu2 %v2310_v30  ;;  %v2394_v41 = vor.u32 %v3146_v37, %v2393_v36  ;;  %v2285_v42 = vld [vmem:[#allocation4 + $0x78] sm:$0xf]  ;;  %v3119_v43 = vld [vmem:[#allocation4 + $0x80] sm:$0xf0]  ;;  %v3092_v45 = vld [vmem:[#allocation2 + $0x24] sm:$0xf0] }
  0x27   :  { %245 = vmatpush.bf16.msra.mxu0 %v2202_v16  ;;  %623 = vmatpush.bf16.msra.mxu3 %v2406_v34  ;;  %v2381_v46 = vld [vmem:[#allocation4 + $0x138] sm:$0xf]  ;;  %v3143_v47 = vld [vmem:[#allocation4 + $0x140] sm:$0xf0]  ;;  %v2179_v49 = vld [vmem:[#allocation2 + $0x28] sm:$0xf0]  ;;  %v2286_v50 = vor.u32 %v3119_v43, %v2285_v42  ;;  %v2178_v51 = vor.u32 %v3092_v45, %v2177_v40 }
  0x28   :  { %259 = vmatpush.bf16.msra.mxu1 %v2206_v17  ;;  %v3091_v48 = vld [vmem:[#allocation2 + $0x24] sm:$0xf]  ;;  %v2169_v52 = vld [vmem:[#allocation2 + $0x10] sm:$0xf]  ;;  %v2382_v53 = vor.u32 %v3143_v47, %v2381_v46  ;;  %v2273_v54 = vld [vmem:[#allocation4 + $0x60] sm:$0xf] }
  0x29   :  { %v3116_v55 = vld [vmem:[#allocation4 + $0x68] sm:$0xf0]  ;;  %v2182_v56 = vor.u32 %v3091_v48, %v2179_v49  ;;  %v3090_v57 = vld [vmem:[#allocation2 + $0x14] sm:$0xf0]  ;;  %v2369_v58 = vld [vmem:[#allocation4 + $0x120] sm:$0xf] }
  0x2a   :  { %610 = vmatpush.bf16.msra.mxu2 %v2298_v38  ;;  %v3140_v59 = vld [vmem:[#allocation4 + $0x128] sm:$0xf0]  ;;  %v3089_v60 = vld [vmem:[#allocation2 + $0x14] sm:$0xf]  ;;  %v2171_v61 = vld [vmem:[#allocation2 + $0x18] sm:$0xf0]  ;;  %v2274_v0 = vor.u32 %v3116_v55, %v2273_v54  ;;  %v2170_v1 = vor.u32 %v3090_v57, %v2169_v52 }
  0x2b   :  { %246 = vmatpush.bf16.msra.mxu0 %v2194_v24  ;;  %624 = vmatpush.bf16.msra.mxu3 %v2394_v41  ;;  %v2161_v62 = vld [vmem:[#allocation2] sm:$0xf]  ;;  %v3088_v63 = vld [vmem:[#allocation2 + $0x4] sm:$0xf0]  ;;  %v3087_v2 = vld [vmem:[#allocation2 + $0x4] sm:$0xf]  ;;  %v2370_v3 = vor.u32 %v3140_v59, %v2369_v58  ;;  %v2174_v6 = vor.u32 %v3089_v60, %v2171_v61 }
  0x2c   :  { %260 = vmatpush.bf16.msra.mxu1 %v2198_v29  ;;  %v2261_v4 = vld [vmem:[#allocation4 + $0x48] sm:$0xf]  ;;  %v3113_v5 = vld [vmem:[#allocation4 + $0x50] sm:$0xf0]  ;;  %v2163_v7 = vld [vmem:[#allocation2 + $0x8] sm:$0xf0]  ;;  %v2162_v16 = vor.u32 %v3088_v63, %v2161_v62 }
  0x2d   :  { %v2357_v8 = vld [vmem:[#allocation4 + $0x108] sm:$0xf]  ;;  %v3137_v9 = vld [vmem:[#allocation4 + $0x110] sm:$0xf0]  ;;  %v138_v10 = vld [vmem:[%s3636_s0] sm:$0xff]  ;;  %v2262_v15 = vor.u32 %v3113_v5, %v2261_v4  ;;  %v2166_v21 = vor.u32 %v3087_v2, %v2163_v7 }
  0x2e   :  { %611 = vmatpush.bf16.msra.mxu2 %v2286_v50  ;;  %v3124_v11 = vld [vmem:[#allocation4 + $0xac] sm:$0xf]  ;;  %v2311_v12 = vld [vmem:[#allocation4 + $0xb4] sm:$0xf0]  ;;  %v2358_v18 = vor.u32 %v3137_v9, %v2357_v8  ;;  %v2249_v19 = vld [vmem:[#allocation4 + $0x30] sm:$0xf] }
  0x2f   :  { %247 = vmatpush.bf16.msra.mxu0 %v2186_v39  ;;  %625 = vmatpush.bf16.msra.mxu3 %v2382_v53  ;;  %v3148_v13 = vld [vmem:[#allocation4 + $0x16c] sm:$0xf]  ;;  %v2407_v14 = vld [vmem:[#allocation4 + $0x174] sm:$0xf0]  ;;  %v3110_v20 = vld [vmem:[#allocation4 + $0x38] sm:$0xf0]  ;;  %v2314_v22 = vor.u32 %v3124_v11, %v2311_v12 }
  0x30   :  { %261 = vmatpush.bf16.msra.mxu1 %v2190_v44  ;;  %v139_v17 = vld [vmem:[%s3636_s0 + $0x8] sm:$0xff]  ;;  %v2345_v23 = vld [vmem:[#allocation4 + $0xf0] sm:$0xf]  ;;  %v3134_v24 = vld [vmem:[#allocation4 + $0xf8] sm:$0xf0]  ;;  %v2410_v25 = vor.u32 %v3148_v13, %v2407_v14  ;;  %v2250_v31 = vor.u32 %v3110_v20, %v2249_v19 }
  0x31   :  { %v3121_v26 = vld [vmem:[#allocation4 + $0x94] sm:$0xf]  ;;  %v2299_v27 = vld [vmem:[#allocation4 + $0x9c] sm:$0xf0]  ;;  %v140_v28 = vpack.c.bf16 %v139_v17, %v138_v10  ;;  %v2346_v32 = vor.u32 %v3134_v24, %v2345_v23  ;;  %v2237_v33 = vld [vmem:[#allocation4 + $0x18] sm:$0xf] }
  0x32   :  { %612 = vmatpush.bf16.msra.mxu2 %v2274_v0  ;;  %v3145_v29 = vld [vmem:[#allocation4 + $0x154] sm:$0xf]  ;;  %v2395_v30 = vld [vmem:[#allocation4 + $0x15c] sm:$0xf0]  ;;  %v3107_v34 = vld [vmem:[#allocation4 + $0x20] sm:$0xf0]  ;;  %v2302_v35 = vor.u32 %v3121_v26, %v2299_v27 }
  0x33   :  { %248 = vmatpush.bf16.msra.mxu0 %v2178_v51  ;;  %626 = vmatpush.bf16.msra.mxu3 %v2370_v3  ;;  %v2333_v36 = vld [vmem:[#allocation4 + $0xd8] sm:$0xf]  ;;  %v3131_v37 = vld [vmem:[#allocation4 + $0xe0] sm:$0xf0]  ;;  %v2398_v38 = vor.u32 %v3145_v29, %v2395_v30  ;;  %v3118_v39 = vld [vmem:[#allocation4 + $0x7c] sm:$0xf]  ;;  %v2238_v43 = vor.u32 %v3107_v34, %v2237_v33 }
  0x34   :  { %262 = vmatpush.bf16.msra.mxu1 %v2182_v56  ;;  %v2287_v40 = vld [vmem:[#allocation4 + $0x84] sm:$0xf0]  ;;  %v3142_v41 = vld [vmem:[#allocation4 + $0x13c] sm:$0xf]  ;;  %v2334_v44 = vor.u32 %v3131_v37, %v2333_v36  ;;  %v3115_v47 = vld [vmem:[#allocation4 + $0x64] sm:$0xf] }
  0x35   :  { %v2383_v42 = vld [vmem:[#allocation4 + $0x144] sm:$0xf0]  ;;  %v2290_v45 = vor.u32 %v3118_v39, %v2287_v40  ;;  %v2275_v48 = vld [vmem:[#allocation4 + $0x6c] sm:$0xf0]  ;;  %v3139_v49 = vld [vmem:[#allocation4 + $0x124] sm:$0xf] }
  0x36   :  { %613 = vmatpush.bf16.msra.mxu2 %v2262_v15  ;;  %v2386_v46 = vor.u32 %v3142_v41, %v2383_v42  ;;  %v2371_v50 = vld [vmem:[#allocation4 + $0x12c] sm:$0xf0]  ;;  %v2278_v51 = vor.u32 %v3115_v47, %v2275_v48  ;;  %v2225_v53 = vld [vmem:[#allocation4] sm:$0xf]  ;;  %v3104_v54 = vld [vmem:[#allocation4 + $0x8] sm:$0xf0] }
  0x37   :  { %249 = vmatpush.bf16.msra.mxu0 %v2170_v1  ;;  %627 = vmatpush.bf16.msra.mxu3 %v2358_v18  ;;  %v2374_v52 = vor.u32 %v3139_v49, %v2371_v50  ;;  %v2321_v55 = vld [vmem:[#allocation4 + $0xc0] sm:$0xf]  ;;  %v2226_v56 = vor.u32 %v3104_v54, %v2225_v53  ;;  %v3128_v57 = vld [vmem:[#allocation4 + $0xc8] sm:$0xf0]  ;;  %v2263_v60 = vld [vmem:[#allocation4 + $0x54] sm:$0xf0] }
  0x38   :  { %263 = vmatpush.bf16.msra.mxu1 %v2174_v6  ;;  %v3112_v58 = vld [vmem:[#allocation4 + $0x4c] sm:$0xf]  ;;  %v2322_v59 = vor.u32 %v3128_v57, %v2321_v55  ;;  %v2359_v62 = vld [vmem:[#allocation4 + $0x114] sm:$0xf0]  ;;  %v2317_v1 = vld [vmem:[#allocation4 + $0xb0] sm:$0xf] }
  0x39   :  { %v3136_v61 = vld [vmem:[#allocation4 + $0x10c] sm:$0xf]  ;;  %v2266_v63 = vor.u32 %v3112_v58, %v2263_v60  ;;  %v3126_v2 = vld [vmem:[#allocation4 + $0xb8] sm:$0xf0]  ;;  %v2413_v3 = vld [vmem:[#allocation4 + $0x170] sm:$0xf] }
  0x3a   :  { %614 = vmatpush.bf16.msra.mxu2 %v2250_v31  ;;  %v2362_v0 = vor.u32 %v3136_v61, %v2359_v62  ;;  %v2318_v4 = vor.u32 %v3126_v2, %v2317_v1  ;;  %v3150_v5 = vld [vmem:[#allocation4 + $0x178] sm:$0xf0]  ;;  %v3109_v7 = vld [vmem:[#allocation4 + $0x34] sm:$0xf]  ;;  %v2251_v8 = vld [vmem:[#allocation4 + $0x3c] sm:$0xf0] }
  0x3b   :  { %250 = vmatpush.bf16.msra.mxu0 %v2162_v16  ;;  %628 = vmatpush.bf16.msra.mxu3 %v2346_v32  ;;  %v2414_v6 = vor.u32 %v3150_v5, %v2413_v3  ;;  %v3133_v9 = vld [vmem:[#allocation4 + $0xf4] sm:$0xf]  ;;  %v2254_v10 = vor.u32 %v3109_v7, %v2251_v8  ;;  %v2347_v11 = vld [vmem:[#allocation4 + $0xfc] sm:$0xf0]  ;;  %v2305_v12 = vld [vmem:[#allocation4 + $0x98] sm:$0xf] }
  0x3c   :  { %264 = vmatpush.bf16.msra.mxu1 %v2166_v21  ;;  %v3123_v13 = vld [vmem:[#allocation4 + $0xa0] sm:$0xf0]  ;;  %v2350_v14 = vor.u32 %v3133_v9, %v2347_v11  ;;  %v2401_v16 = vld [vmem:[#allocation4 + $0x158] sm:$0xf]  ;;  %v3106_v19 = vld [vmem:[#allocation4 + $0x1c] sm:$0xf] }
  0x3d   :  { %v2306_v15 = vor.u32 %v3123_v13, %v2305_v12  ;;  %v3147_v17 = vld [vmem:[#allocation4 + $0x160] sm:$0xf0]  ;;  %v2239_v20 = vld [vmem:[#allocation4 + $0x24] sm:$0xf0]  ;;  %v3130_v21 = vld [vmem:[#allocation4 + $0xdc] sm:$0xf] }
  0x3e   :  { %251 = vmatmul.bf16.vlgmr.msra.gmra.mxu0 %v140_v28  ;;  %615 = vmatpush.bf16.msra.mxu2 %v2238_v43  ;;  %v2402_v18 = vor.u32 %v3147_v17, %v2401_v16  ;;  %v2335_v23 = vld [vmem:[#allocation4 + $0xe4] sm:$0xf0]  ;;  %v2293_v24 = vld [vmem:[#allocation4 + $0x80] sm:$0xf]  ;;  %v3144_v29 = vld [vmem:[#allocation4 + $0x148] sm:$0xf0] }
  0x3f   :  { %637 = vmatpush.bf16.msrb.mxu0 %v2314_v22  ;;  %265 = vmatmul.bf16.vlgmr.msra.gmra.mxu1 %v140_v28  ;;  %v2242_v22 = vor.u32 %v3106_v19, %v2239_v20  ;;  %v2338_v26 = vor.u32 %v3130_v21, %v2335_v23  ;;  %v2389_v28 = vld [vmem:[#allocation4 + $0x140] sm:$0xf]  ;;  %v3103_v31 = vld [vmem:[#allocation4 + $0x4] sm:$0xf]  ;;  %v2227_v32 = vld [vmem:[#allocation4 + $0xc] sm:$0xf0] }
  0x40   :  { %651 = vmatpush.bf16.msrb.mxu1 %v2410_v25  ;;  %629 = vmatpush.bf16.msra.mxu3 %v2334_v44  ;;  %v3120_v25 = vld [vmem:[#allocation4 + $0x88] sm:$0xf0]  ;;  %v2390_v30 = vor.u32 %v3144_v29, %v2389_v28  ;;  %v3127_v33 = vld [vmem:[#allocation4 + $0xc4] sm:$0xf]  ;;  %v2230_v34 = vor.u32 %v3103_v31, %v2227_v32  ;;  %v2281_v36 = vld [vmem:[#allocation4 + $0x68] sm:$0xf] }
  0x41   :  { %v2294_v27 = vor.u32 %v3120_v25, %v2293_v24  ;;  %v3117_v37 = vld [vmem:[#allocation4 + $0x70] sm:$0xf0]  ;;  %v2377_v40 = vld [vmem:[#allocation4 + $0x128] sm:$0xf]  ;;  %v2269_v43 = vld [vmem:[#allocation4 + $0x50] sm:$0xf] }
  0x42   :  { %616 = vmatpush.bf16.msra.mxu2 %v2226_v56  ;;  %v2282_v39 = vor.u32 %v3117_v37, %v2281_v36  ;;  %v3141_v41 = vld [vmem:[#allocation4 + $0x130] sm:$0xf0]  ;;  %v3114_v44 = vld [vmem:[#allocation4 + $0x58] sm:$0xf0]  ;;  %v2257_v49 = vld [vmem:[#allocation4 + $0x38] sm:$0xf] }
  0x43   :  { %638 = vmatpush.bf16.msrb.mxu0 %v2302_v35  ;;  %v2323_v35 = vld [vmem:[#allocation4 + $0xcc] sm:$0xf0]  ;;  %v2378_v42 = vor.u32 %v3141_v41, %v2377_v40  ;;  %v3138_v47 = vld [vmem:[#allocation4 + $0x118] sm:$0xf0]  ;;  %v3111_v50 = vld [vmem:[#allocation4 + $0x40] sm:$0xf0] }
  0x44   :  { %652 = vmatpush.bf16.msrb.mxu1 %v2398_v38  ;;  %630 = vmatpush.bf16.msra.mxu3 %v2322_v59  ;;  %v2326_v38 = vor.u32 %v3127_v33, %v2323_v35  ;;  %v2258_v53 = vor.u32 %v3111_v50, %v2257_v49  ;;  %v2245_v55 = vld [vmem:[#allocation4 + $0x20] sm:$0xf]  ;;  %v3108_v56 = vld [vmem:[#allocation4 + $0x28] sm:$0xf0]  ;;  %v2233_v61 = vld [vmem:[#allocation4 + $0x8] sm:$0xf] }
  0x45   :  { %v2341_v57 = vld [vmem:[#allocation4 + $0xe0] sm:$0xf]  ;;  %v3132_v58 = vld [vmem:[#allocation4 + $0xe8] sm:$0xf0]  ;;  %v2246_v59 = vor.u32 %v3108_v56, %v2245_v55  ;;  %v3105_v62 = vld [vmem:[#allocation4 + $0x10] sm:$0xf0] }
  0x46   :  { %665 = vmatpush.bf16.msrb.mxu2 %v2318_v4  ;;  %v2342_v60 = vor.u32 %v3132_v58, %v2341_v57  ;;  %v2234_v1 = vor.u32 %v3105_v62, %v2233_v61  ;;  %v157_v2 = vld [vmem:[%s3638_s2] sm:$0x3]  ;;  %v2501_v8 = vld [vmem:[#allocation6 + $0xa8] sm:$0xf]  ;;  %v3173_v9 = vld [vmem:[#allocation6 + $0xb0] sm:$0xf0] }
  0x47   :  { %639 = vmatpush.bf16.msrb.mxu0 %v2290_v45  ;;  %v2365_v45 = vld [vmem:[#allocation4 + $0x110] sm:$0xf]  ;;  %v159_v5 = vperm.slane %v157_v2, 0  ;;  %v2502_v11 = vor.u32 %v3173_v9, %v2501_v8  ;;  %v3170_v12 = vld [vmem:[#allocation6 + $0x98] sm:$0xf0] }
  0x48   :  { %653 = vmatpush.bf16.msrb.mxu1 %v2386_v46  ;;  %679 = vmatpush.bf16.msrb.mxu3 %v2414_v6  ;;  %v2270_v46 = vor.u32 %v3114_v44, %v2269_v43  ;;  %v2366_v48 = vor.u32 %v3138_v47, %v2365_v45  ;;  %v160_v6 = vperm.slane %v157_v2, 1  ;;  %v3197_v16 = vld [vmem:[#allocation6 + $0x170] sm:$0xf0]  ;;  %v3167_v19 = vld [vmem:[#allocation6 + $0x80] sm:$0xf0] }
  0x49   :  { %v2585_v21 = vld [vmem:[#allocation6 + $0x150] sm:$0xf]  ;;  %v2573_v29 = vld [vmem:[#allocation6 + $0x138] sm:$0xf]  ;;  %v3164_v35 = vld [vmem:[#allocation6 + $0x68] sm:$0xf0] }
  0x4a   :  { %666 = vmatpush.bf16.msrb.mxu2 %v2306_v15  ;;  %v2597_v15 = vld [vmem:[#allocation6 + $0x168] sm:$0xf]  ;;  %v3172_v37 = vld [vmem:[#allocation6 + $0xac] sm:$0xf]  ;;  %v2491_v55 = vld [vmem:[#allocation6 + $0x9c] sm:$0xf0] }
  0x4b   :  { %640 = vmatpush.bf16.msrb.mxu0 %v2278_v51  ;;  %v2353_v51 = vld [vmem:[#allocation4 + $0xf8] sm:$0xf]  ;;  %v2598_v20 = vor.u32 %v3197_v16, %v2597_v15  ;;  %v3188_v43 = vld [vmem:[#allocation6 + $0x128] sm:$0xf0]  ;;  %v2453_v50 = vld [vmem:[#allocation6 + $0x48] sm:$0xf] }
  0x4c   :  { %654 = vmatpush.bf16.msrb.mxu1 %v2374_v52  ;;  %680 = vmatpush.bf16.msrb.mxu3 %v2402_v18  ;;  %v3135_v52 = vld [vmem:[#allocation4 + $0x100] sm:$0xf0]  ;;  %v2477_v18 = vld [vmem:[#allocation6 + $0x78] sm:$0xf]  ;;  %v2549_v58 = vld [vmem:[#allocation6 + $0x108] sm:$0xf] }
  0x4d   :  { %v2354_v54 = vor.u32 %v3135_v52, %v2353_v51  ;;  %v2478_v28 = vor.u32 %v3167_v19, %v2477_v18  ;;  %v3221_v51 = vld [vmem:[#allocation6 + $0x230] sm:$0xf0]  ;;  %v2441_v62 = vld [vmem:[#allocation6 + $0x30] sm:$0xf]  ;;  %v3196_v15 = vld [vmem:[#allocation6 + $0x16c] sm:$0xf] }
  0x4e   :  { %667 = vmatpush.bf16.msrb.mxu2 %v2294_v27  ;;  %v2467_v8 = vld [vmem:[#allocation6 + $0x6c] sm:$0xf0]  ;;  %v2599_v16 = vld [vmem:[#allocation6 + $0x174] sm:$0xf0] }
  0x4f   :  { %641 = vmatpush.bf16.msrb.mxu0 %v2266_v63  ;;  %v2329_v63 = vld [vmem:[#allocation4 + $0xc8] sm:$0xf]  ;;  %v2602_v19 = vor.u32 %v3196_v15, %v2599_v16  ;;  %v3214_v15 = vld [vmem:[#allocation6 + $0x1fc] sm:$0xf] }
  0x50   :  { %655 = vmatpush.bf16.msrb.mxu1 %v2362_v0  ;;  %681 = vmatpush.bf16.msrb.mxu3 %v2390_v30  ;;  %v3129_v0 = vld [vmem:[#allocation4 + $0xd0] sm:$0xf0]  ;;  %v3191_v30 = vld [vmem:[#allocation6 + $0x140] sm:$0xf0]  ;;  %v2671_v16 = vld [vmem:[#allocation6 + $0x204] sm:$0xf0] }
  0x51   :  { %v2330_v3 = vor.u32 %v3129_v0, %v2329_v63  ;;  %v3158_v63 = vld [vmem:[#allocation6 + $0x38] sm:$0xf0] }
  0x52   :  { %668 = vmatpush.bf16.msrb.mxu2 %v2282_v39  ;;  %v2574_v39 = vor.u32 %v3191_v30, %v2573_v29  ;;  %v3166_v0 = vld [vmem:[#allocation6 + $0x7c] sm:$0xf]  ;;  %v3193_v29 = vld [vmem:[#allocation6 + $0x154] sm:$0xf]  ;;  %v2587_v30 = vld [vmem:[#allocation6 + $0x15c] sm:$0xf0] }
  0x53   :  { %642 = vmatpush.bf16.msrb.mxu0 %v2254_v10  ;;  %v2489_v10 = vld [vmem:[#allocation6 + $0x90] sm:$0xf] }
  0x54   :  { %656 = vmatpush.bf16.msrb.mxu1 %v2350_v14  ;;  %682 = vmatpush.bf16.msrb.mxu3 %v2378_v42  ;;  %v2490_v14 = vor.u32 %v3170_v12, %v2489_v10  ;;  %v2561_v42 = vld [vmem:[#allocation6 + $0x120] sm:$0xf]  ;;  %v3152_v12 = vld [vmem:[#allocation6 + $0x8] sm:$0xf0] }
  0x55   :  { %v2562_v56 = vor.u32 %v3188_v43, %v2561_v42  ;;  %v2575_v42 = vld [vmem:[#allocation6 + $0x144] sm:$0xf0] }
  0x56   :  { %669 = vmatpush.bf16.msrb.mxu2 %v2270_v46  ;;  %v2693_v46 = vld [vmem:[#allocation6 + $0x228] sm:$0xf] }
  0x57   :  { %643 = vmatpush.bf16.msrb.mxu0 %v2242_v22  ;;  %v3194_v22 = vld [vmem:[#allocation6 + $0x158] sm:$0xf0]  ;;  %v2694_v57 = vor.u32 %v3221_v51, %v2693_v46  ;;  %v2657_v46 = vld [vmem:[#allocation6 + $0x1e0] sm:$0xf] }
  0x58   :  { %657 = vmatpush.bf16.msrb.mxu1 %v2338_v26  ;;  %683 = vmatpush.bf16.msrb.mxu3 %v2366_v48  ;;  %v2586_v24 = vor.u32 %v3194_v22, %v2585_v21  ;;  %v3182_v21 = vld [vmem:[#allocation6 + $0xf8] sm:$0xf0]  ;;  %v2681_v22 = vld [vmem:[#allocation6 + $0x210] sm:$0xf] }
  0x5a   :  { %670 = vmatpush.bf16.msrb.mxu2 %v2258_v53  ;;  %v3161_v53 = vld [vmem:[#allocation6 + $0x50] sm:$0xf0] }
  0x5b   :  { %644 = vmatpush.bf16.msrb.mxu0 %v2230_v34  ;;  %v2465_v34 = vld [vmem:[#allocation6 + $0x60] sm:$0xf] }
  0x5c   :  { %658 = vmatpush.bf16.msrb.mxu1 %v2326_v38  ;;  %684 = vmatpush.bf16.msrb.mxu3 %v2354_v54  ;;  %v2503_v38 = vld [vmem:[#allocation6 + $0xb4] sm:$0xf0]  ;;  %v2466_v48 = vor.u32 %v3164_v35, %v2465_v34  ;;  %v3169_v54 = vld [vmem:[#allocation6 + $0x94] sm:$0xf] }
  0x5d   :  { %v2506_v49 = vor.u32 %v3172_v37, %v2503_v38  ;;  %v2494_v61 = vor.u32 %v3169_v54, %v2491_v55  ;;  %v2669_v34 = vld [vmem:[#allocation6 + $0x1f8] sm:$0xf]  ;;  %v3154_v37 = vld [vmem:[#allocation6 + $0x1c] sm:$0xf]  ;;  %v2431_v38 = vld [vmem:[#allocation6 + $0x24] sm:$0xf0] }
  0x5e   :  { %671 = vmatpush.bf16.msrb.mxu2 %v2246_v59  ;;  %v3185_v59 = vld [vmem:[#allocation6 + $0x110] sm:$0xf0]  ;;  %v2563_v54 = vld [vmem:[#allocation6 + $0x12c] sm:$0xf0]  ;;  %v3220_v55 = vld [vmem:[#allocation6 + $0x22c] sm:$0xf] }
  0x5f   :  { %1196 = vmatpush.bf16.msra.mxu0 %v2502_v11  ;;  %v2550_v2 = vor.u32 %v3185_v59, %v2549_v58  ;;  %v2417_v11 = vld [vmem:[#allocation6] sm:$0xf]  ;;  %v2605_v58 = vld [vmem:[#allocation6 + $0x170] sm:$0xf]  ;;  %v3198_v59 = vld [vmem:[#allocation6 + $0x178] sm:$0xf0] }
  0x60   :  { %685 = vmatpush.bf16.msrb.mxu3 %v2342_v60  ;;  %1210 = vmatpush.bf16.msra.mxu1 %v2598_v20  ;;  %v2454_v60 = vor.u32 %v3161_v53, %v2453_v50  ;;  %v2537_v20 = vld [vmem:[#allocation6 + $0xf0] sm:$0xf]  ;;  %v3187_v53 = vld [vmem:[#allocation6 + $0x124] sm:$0xf] }
  0x61   :  { %v2419_v50 = vld [vmem:[#allocation6 + $0xc] sm:$0xf0] }
  0x62   :  { %672 = vmatpush.bf16.msrb.mxu2 %v2234_v1  ;;  %v2479_v1 = vld [vmem:[#allocation6 + $0x84] sm:$0xf0] }
  0x63   :  { %1197 = vmatpush.bf16.msra.mxu0 %v2490_v14  ;;  %v2455_v14 = vld [vmem:[#allocation6 + $0x54] sm:$0xf0] }
  0x64   :  { %686 = vmatpush.bf16.msrb.mxu3 %v2330_v3  ;;  %1211 = vmatpush.bf16.msra.mxu1 %v2586_v24  ;;  %v2442_v3 = vor.u32 %v3158_v63, %v2441_v62  ;;  %v3218_v24 = vld [vmem:[#allocation6 + $0x218] sm:$0xf0]  ;;  %v2645_v62 = vld [vmem:[#allocation6 + $0x1c8] sm:$0xf]  ;;  %v3209_v63 = vld [vmem:[#allocation6 + $0x1d0] sm:$0xf0] }
  0x67   :  { %1198 = vmatpush.bf16.msra.mxu0 %v2478_v28 }
  0x68   :  { %1212 = vmatpush.bf16.msra.mxu1 %v2574_v39 }
  0x6b   :  { %1199 = vmatpush.bf16.msra.mxu0 %v2466_v48  ;;  %v3212_v48 = vld [vmem:[#allocation6 + $0x1e8] sm:$0xf0] }
  0x6c   :  { %1213 = vmatpush.bf16.msra.mxu1 %v2562_v56  ;;  %v2658_v51 = vor.u32 %v3212_v48, %v2657_v46  ;;  %v2566_v56 = vor.u32 %v3187_v53, %v2563_v54  ;;  %v3596_v48 = vld [vmem:[%s3640_s4] sm:$0x7]  ;;  %v3171_v54 = vld [vmem:[#allocation6 + $0xa0] sm:$0xf0] }
  0x6f   :  { %1200 = vmatpush.bf16.msra.mxu0 %v2454_v60 }
  0x70   :  { %1214 = vmatpush.bf16.msra.mxu1 %v2550_v2  ;;  %v2551_v2 = vld [vmem:[#allocation6 + $0x114] sm:$0xf0] }
  0x73   :  { %1201 = vmatpush.bf16.msra.mxu0 %v2442_v3  ;;  %v3217_v3 = vld [vmem:[#allocation6 + $0x214] sm:$0xf] }
  0xbb   :  { %v252_v4 = vpop.f32.mrf.mxu0 }
  0xbc   :  { %v266_v7 = vpop.f32.mrf.mxu1  ;;  %v253_v13 = vadd.f32 %v252_v4, %v159_v5  ;;  %v2482_v4 = vor.u32 %v3166_v0, %v2479_v1  ;;  %v3184_v0 = vld [vmem:[#allocation6 + $0x10c] sm:$0xf]  ;;  %v2646_v1 = vor.u32 %v3209_v63, %v2645_v62  ;;  %v2623_v62 = vld [vmem:[#allocation6 + $0x1a4] sm:$0xf0]  ;;  %v2485_v63 = vld [vmem:[#allocation6 + $0x80] sm:$0xf] }
  0xbd   :  { %v267_v17 = vadd.f32 %v266_v7, %v160_v6  ;;  %v3163_v7 = vld [vmem:[#allocation6 + $0x64] sm:$0xf] }
  0xbe   :  { %v271_v25 = vmul.f32 0.01, %v253_v13  ;;  %v2470_v10 = vor.u32 %v3163_v7, %v2467_v8  ;;  %v2593_v7 = vld [vmem:[#allocation6 + $0x158] sm:$0xf]  ;;  %v3195_v8 = vld [vmem:[#allocation6 + $0x160] sm:$0xf0] }
  0xbf   :  { %v272_v31 = vmul.f32 0.01, %v267_v17 }
  0xc0   :  { %v275_v40 = vmax.f32 %v253_v13, %v271_v25  ;;  %v3160_v13 = vld [vmem:[#allocation6 + $0x4c] sm:$0xf]  ;;  %v3157_v25 = vld [vmem:[#allocation6 + $0x34] sm:$0xf] }
  0xc1   :  { %v276_v44 = vmax.f32 %v267_v17, %v272_v31  ;;  %v2418_v17 = vor.u32 %v3152_v12, %v2417_v11  ;;  %v2458_v18 = vor.u32 %v3160_v13, %v2455_v14  ;;  %v2590_v31 = vor.u32 %v3193_v29, %v2587_v30  ;;  %v3206_v11 = vld [vmem:[#allocation6 + $0x1b8] sm:$0xf0]  ;;  %v3181_v12 = vld [vmem:[#allocation6 + $0xf4] sm:$0xf]  ;;  %v2539_v14 = vld [vmem:[#allocation6 + $0xfc] sm:$0xf0] }
  0xc3   :  { %v254_v23 = vpop.f32.mrf.mxu0 }
  0xc4   :  { %v255_v26 = vadd.f32 %v254_v23, %v159_v5  ;;  %v268_v27 = vpop.f32.mrf.mxu1  ;;  %v2429_v5 = vld [vmem:[#allocation6 + $0x18] sm:$0xf]  ;;  %v2538_v23 = vor.u32 %v3182_v21, %v2537_v20  ;;  %v3192_v20 = vld [vmem:[#allocation6 + $0x148] sm:$0xf0] }
  0xc5   :  { %v269_v32 = vadd.f32 %v268_v27, %v160_v6  ;;  %v3155_v6 = vld [vmem:[#allocation6 + $0x20] sm:$0xf0]  ;;  %v2682_v27 = vor.u32 %v3218_v24, %v2681_v22  ;;  %v2621_v22 = vld [vmem:[#allocation6 + $0x198] sm:$0xf]  ;;  %v3178_v24 = vld [vmem:[#allocation6 + $0xdc] sm:$0xf] }
  0xc6   :  { %v273_v33 = vmul.f32 0.01, %v255_v26  ;;  %v2430_v9 = vor.u32 %v3155_v6, %v2429_v5  ;;  %1215 = vmatpush.bf16.msra.mxu1 %v2538_v23  ;;  %v2554_v5 = vor.u32 %v3184_v0, %v2551_v2  ;;  %v3203_v23 = vld [vmem:[#allocation6 + $0x1a0] sm:$0xf0]  ;;  %v3168_v2 = vld [vmem:[#allocation6 + $0x88] sm:$0xf0] }
  0xc7   :  { %v274_v36 = vmul.f32 0.01, %v269_v32 }
  0xc8   :  { %v277_v41 = vmax.f32 %v255_v26, %v273_v33  ;;  %1202 = vmatpush.bf16.msra.mxu0 %v2430_v9  ;;  %v2443_v26 = vld [vmem:[#allocation6 + $0x3c] sm:$0xf0]  ;;  %v3179_v33 = vld [vmem:[#allocation6 + $0xe0] sm:$0xf0]  ;;  %v2594_v9 = vor.u32 %v3195_v8, %v2593_v7 }
  0xc9   :  { %v278_v45 = vmax.f32 %v269_v32, %v274_v36  ;;  %v2446_v28 = vor.u32 %v3157_v25, %v2443_v26  ;;  %v2525_v32 = vld [vmem:[#allocation6 + $0xd8] sm:$0xf]  ;;  %v3215_v36 = vld [vmem:[#allocation6 + $0x200] sm:$0xf0]  ;;  %v2622_v25 = vor.u32 %v3203_v23, %v2621_v22  ;;  %v2527_v26 = vld [vmem:[#allocation6 + $0xe4] sm:$0xf0] }
  0xca   :  { %v279_v47 = vpack.c.bf16 %v277_v41, %v275_v40  ;;  %v2526_v35 = vor.u32 %v3179_v33, %v2525_v32  ;;  %v2670_v39 = vor.u32 %v3215_v36, %v2669_v34  ;;  %v2434_v40 = vor.u32 %v3154_v37, %v2431_v38  ;;  %v3190_v41 = vld [vmem:[#allocation6 + $0x13c] sm:$0xf]  ;;  %v3189_v32 = vld [vmem:[#allocation6 + $0x130] sm:$0xf0]  ;;  %v2609_v34 = vld [vmem:[#allocation6 + $0x180] sm:$0xf] }
  0xcb   :  { %v280_v52 = vpack.c.bf16 %v278_v45, %v276_v44  ;;  %v2578_v43 = vor.u32 %v3190_v41, %v2575_v42  ;;  %v2513_v44 = vld [vmem:[#allocation6 + $0xc0] sm:$0xf]  ;;  %v3176_v45 = vld [vmem:[#allocation6 + $0xc8] sm:$0xf0]  ;;  %v2530_v29 = vor.u32 %v3178_v24, %v2527_v26  ;;  %v3175_v36 = vld [vmem:[#allocation6 + $0xc4] sm:$0xf] }
  0xcc   :  { %617 = vmatmul.bf16.vlgmr.msra.gmra.mxu2 %v279_v47  ;;  %645 = vmatmul.bf16.vlgmr.msrb.gmra.mxu0 %v279_v47  ;;  %v2515_v38 = vld [vmem:[#allocation6 + $0xcc] sm:$0xf0]  ;;  %v3199_v8 = vld [vmem:[#allocation6 + $0x184] sm:$0xf]  ;;  %v3162_v23 = vld [vmem:[#allocation6 + $0x58] sm:$0xf0] }
  0xcd   :  { %631 = vmatmul.bf16.vlgmr.msra.gmra.mxu3 %v280_v52  ;;  %659 = vmatmul.bf16.vlgmr.msrb.gmra.mxu1 %v280_v52  ;;  %v2518_v41 = vor.u32 %v3175_v36, %v2515_v38  ;;  %v2461_v22 = vld [vmem:[#allocation6 + $0x50] sm:$0xf] }
  0xce   :  { %1238 = vmatpush.bf16.msra.mxu3 %v2506_v49  ;;  %1224 = vmatpush.bf16.msra.mxu2 %v2694_v57  ;;  %v3151_v49 = vld [vmem:[#allocation6 + $0x4] sm:$0xf]  ;;  %v2695_v57 = vld [vmem:[#allocation6 + $0x234] sm:$0xf0]  ;;  %v2462_v26 = vor.u32 %v3162_v23, %v2461_v22  ;;  %v3204_v22 = vld [vmem:[#allocation6 + $0x1a8] sm:$0xf0] }
  0xcf   :  { %1203 = vmatpush.bf16.msra.mxu0 %v2418_v17  ;;  %1216 = vmatpush.bf16.msra.mxu1 %v2526_v35  ;;  %v2698_v60 = vor.u32 %v3220_v55, %v2695_v57  ;;  %v2542_v17 = vor.u32 %v3181_v12, %v2539_v14  ;;  %v3200_v35 = vld [vmem:[#allocation6 + $0x188] sm:$0xf0]  ;;  %v2545_v55 = vld [vmem:[#allocation6 + $0xf8] sm:$0xf]  ;;  %v2521_v14 = vld [vmem:[#allocation6 + $0xc8] sm:$0xf] }
  0xd0   :  { %v2610_v37 = vor.u32 %v3200_v35, %v2609_v34 }
  0xd2   :  { %1239 = vmatpush.bf16.msra.mxu3 %v2494_v61  ;;  %1225 = vmatpush.bf16.msra.mxu2 %v2682_v27  ;;  %v2606_v61 = vor.u32 %v3198_v59, %v2605_v58  ;;  %v3211_v27 = vld [vmem:[#allocation6 + $0x1e4] sm:$0xf]  ;;  %v348_v59 = vperm.slane %v3596_v48, 1 }
  0xd3   :  { %1252 = vmatpush.bf16.msrb.mxu0 %v2602_v19  ;;  %v2581_v19 = vld [vmem:[#allocation6 + $0x140] sm:$0xf] }
  0xd4   :  { %v2582_v21 = vor.u32 %v3192_v20, %v2581_v19 }
  0xd6   :  { %1240 = vmatpush.bf16.msra.mxu3 %v2482_v4  ;;  %1226 = vmatpush.bf16.msra.mxu2 %v2670_v39  ;;  %v2683_v4 = vld [vmem:[#allocation6 + $0x21c] sm:$0xf0]  ;;  %v3208_v39 = vld [vmem:[#allocation6 + $0x1cc] sm:$0xf] }
  0xd7   :  { %1253 = vmatpush.bf16.msrb.mxu0 %v2590_v31  ;;  %v2686_v6 = vor.u32 %v3217_v3, %v2683_v4  ;;  %v2569_v31 = vld [vmem:[#allocation6 + $0x128] sm:$0xf]  ;;  %v2533_v3 = vld [vmem:[#allocation6 + $0xe0] sm:$0xf]  ;;  %v3180_v4 = vld [vmem:[#allocation6 + $0xe8] sm:$0xf0] }
  0xd8   :  { %v2570_v33 = vor.u32 %v3189_v32, %v2569_v31  ;;  %v3159_v31 = vld [vmem:[#allocation6 + $0x40] sm:$0xf0] }
  0xda   :  { %1241 = vmatpush.bf16.msra.mxu3 %v2470_v10  ;;  %1227 = vmatpush.bf16.msra.mxu2 %v2658_v51  ;;  %v2633_v10 = vld [vmem:[#allocation6 + $0x1b0] sm:$0xf]  ;;  %v2635_v51 = vld [vmem:[#allocation6 + $0x1bc] sm:$0xf0] }
  0xdb   :  { %1254 = vmatpush.bf16.msrb.mxu0 %v2578_v43  ;;  %v2634_v13 = vor.u32 %v3206_v11, %v2633_v10  ;;  %v2509_v43 = vld [vmem:[#allocation6 + $0xb0] sm:$0xf]  ;;  %v2473_v10 = vld [vmem:[#allocation6 + $0x68] sm:$0xf]  ;;  %v347_v11 = vperm.slane %v3596_v48, 0 }
  0xdc   :  { %673 = vmatmul.bf16.vlgmr.msrb.gmra.mxu2 %v279_v47  ;;  %v2514_v47 = vor.u32 %v3176_v45, %v2513_v44  ;;  %v3174_v44 = vld [vmem:[#allocation6 + $0xb8] sm:$0xf0]  ;;  %v2557_v45 = vld [vmem:[#allocation6 + $0x110] sm:$0xf] }
  0xdd   :  { %687 = vmatmul.bf16.vlgmr.msrb.gmra.mxu3 %v280_v52  ;;  %v2422_v52 = vor.u32 %v3151_v49, %v2419_v50  ;;  %v2510_v46 = vor.u32 %v3174_v44, %v2509_v43  ;;  %v3205_v50 = vld [vmem:[#allocation6 + $0x1b4] sm:$0xf] }
  0xde   :  { %1242 = vmatpush.bf16.msra.mxu3 %v2458_v18  ;;  %1217 = vmatpush.bf16.msra.mxu1 %v2514_v47  ;;  %v2674_v18 = vor.u32 %v3214_v15, %v2671_v16  ;;  %v3186_v47 = vld [vmem:[#allocation6 + $0x118] sm:$0xf0]  ;;  %v2638_v53 = vor.u32 %v3205_v50, %v2635_v51  ;;  %v2425_v50 = vld [vmem:[#allocation6 + $0x8] sm:$0xf]  ;;  %v3153_v51 = vld [vmem:[#allocation6 + $0x10] sm:$0xf0] }
  0xdf   :  { %1255 = vmatpush.bf16.msrb.mxu0 %v2566_v56  ;;  %1228 = vmatpush.bf16.msra.mxu2 %v2646_v1  ;;  %v2558_v49 = vor.u32 %v3186_v47, %v2557_v45  ;;  %v3183_v56 = vld [vmem:[#allocation6 + $0x100] sm:$0xf0]  ;;  %v3222_v47 = vld [vmem:[#allocation6 + $0x238] sm:$0xf0] }
  0xe0   :  { %v2546_v58 = vor.u32 %v3183_v56, %v2545_v55  ;;  %v349_v55 = vperm.slane %v3596_v48, 2  ;;  %v2665_v48 = vld [vmem:[#allocation6 + $0x1e8] sm:$0xf] }
  0xe2   :  { %1243 = vmatpush.bf16.msra.mxu3 %v2446_v28  ;;  %1266 = vmatpush.bf16.msrb.mxu1 %v2698_v60  ;;  %v2659_v28 = vld [vmem:[#allocation6 + $0x1ec] sm:$0xf0] }
  0xe3   :  { %1256 = vmatpush.bf16.msrb.mxu0 %v2554_v5  ;;  %1229 = vmatpush.bf16.msra.mxu2 %v2634_v13  ;;  %v2662_v30 = vor.u32 %v3211_v27, %v2659_v28  ;;  %v2486_v5 = vor.u32 %v3168_v2, %v2485_v63  ;;  %v3165_v13 = vld [vmem:[#allocation6 + $0x70] sm:$0xf0] }
  0xe4   :  { %v2474_v16 = vor.u32 %v3165_v13, %v2473_v10  ;;  %v3210_v13 = vld [vmem:[#allocation6 + $0x1d8] sm:$0xf0] }
  0xe6   :  { %1244 = vmatpush.bf16.msra.mxu3 %v2434_v40  ;;  %1267 = vmatpush.bf16.msrb.mxu1 %v2686_v6  ;;  %v2647_v40 = vld [vmem:[#allocation6 + $0x1d4] sm:$0xf0]  ;;  %v2534_v6 = vor.u32 %v3180_v4, %v2533_v3 }
  0xe7   :  { %1257 = vmatpush.bf16.msrb.mxu0 %v2542_v17  ;;  %1230 = vmatpush.bf16.msra.mxu2 %v2622_v25  ;;  %v2650_v42 = vor.u32 %v3208_v39, %v2647_v40  ;;  %v3177_v17 = vld [vmem:[#allocation6 + $0xd0] sm:$0xf0]  ;;  %v2437_v40 = vld [vmem:[#allocation6 + $0x20] sm:$0xf] }
  0xe8   :  { %v2522_v20 = vor.u32 %v3177_v17, %v2521_v14 }
  0xea   :  { %1245 = vmatpush.bf16.msra.mxu3 %v2422_v52  ;;  %1268 = vmatpush.bf16.msrb.mxu1 %v2674_v18  ;;  %v2497_v52 = vld [vmem:[#allocation6 + $0x98] sm:$0xf] }
  0xeb   :  { %1258 = vmatpush.bf16.msrb.mxu0 %v2530_v29  ;;  %1231 = vmatpush.bf16.msra.mxu2 %v2610_v37  ;;  %v2498_v57 = vor.u32 %v3171_v54, %v2497_v52  ;;  %v2426_v52 = vor.u32 %v3153_v51, %v2425_v50 }
  0xee   :  { %1294 = vmatpush.bf16.msrb.mxu3 %v2606_v61  ;;  %1269 = vmatpush.bf16.msrb.mxu1 %v2662_v30  ;;  %v3202_v61 = vld [vmem:[#allocation6 + $0x19c] sm:$0xf]  ;;  %v2449_v30 = vld [vmem:[#allocation6 + $0x38] sm:$0xf] }
  0xef   :  { %1259 = vmatpush.bf16.msrb.mxu0 %v2518_v41  ;;  %1280 = vmatpush.bf16.msrb.mxu2 %v2510_v46  ;;  %v2626_v1 = vor.u32 %v3202_v61, %v2623_v62  ;;  %v2450_v32 = vor.u32 %v3159_v31, %v2449_v30  ;;  %v3156_v41 = vld [vmem:[#allocation6 + $0x28] sm:$0xf0]  ;;  %v2701_v46 = vld [vmem:[#allocation6 + $0x230] sm:$0xf]  ;;  %v3219_v61 = vld [vmem:[#allocation6 + $0x220] sm:$0xf0] }
  0xf0   :  { %v2753_v30 = vld [vmem:[#allocation7 + $0x60] sm:$0xf]  ;;  %v3236_v31 = vld [vmem:[#allocation7 + $0x64] sm:$0xf0] }
  0xf2   :  { %1295 = vmatpush.bf16.msrb.mxu3 %v2594_v9  ;;  %1270 = vmatpush.bf16.msrb.mxu1 %v2650_v42  ;;  %v2611_v9 = vld [vmem:[#allocation6 + $0x18c] sm:$0xf0]  ;;  %v2438_v42 = vor.u32 %v3156_v41, %v2437_v40  ;;  %v3252_v40 = vld [vmem:[#allocation7 + $0xe4] sm:$0xf0] }
  0xf3   :  { %1281 = vmatpush.bf16.msrb.mxu2 %v2498_v57  ;;  %v2614_v12 = vor.u32 %v3199_v8, %v2611_v9  ;;  %v2702_v57 = vor.u32 %v3222_v47, %v2701_v46  ;;  %v3250_v46 = vld [vmem:[#allocation7 + $0xd4] sm:$0xf0]  ;;  %v3237_v47 = vld [vmem:[#allocation7 + $0x74] sm:$0xf] }
  0xf6   :  { %1296 = vmatpush.bf16.msrb.mxu3 %v2582_v21  ;;  %1271 = vmatpush.bf16.msrb.mxu1 %v2638_v53 }
  0xf7   :  { %1282 = vmatpush.bf16.msrb.mxu2 %v2486_v5 }
  0xfa   :  { %1297 = vmatpush.bf16.msrb.mxu3 %v2570_v33  ;;  %1272 = vmatpush.bf16.msrb.mxu1 %v2626_v1  ;;  %v3216_v1 = vld [vmem:[#allocation6 + $0x208] sm:$0xf0] }
  0xfb   :  { %1283 = vmatpush.bf16.msrb.mxu2 %v2474_v16 }
  0xfe   :  { %1298 = vmatpush.bf16.msrb.mxu3 %v2558_v49  ;;  %1273 = vmatpush.bf16.msrb.mxu1 %v2614_v12  ;;  %v2653_v12 = vld [vmem:[#allocation6 + $0x1d0] sm:$0xf] }
  0xff   :  { %1284 = vmatpush.bf16.msrb.mxu2 %v2462_v26  ;;  %v2654_v17 = vor.u32 %v3210_v13, %v2653_v12 }
 0x102   :  { %1299 = vmatpush.bf16.msrb.mxu3 %v2546_v58 }
 0x103   :  { %1285 = vmatpush.bf16.msrb.mxu2 %v2450_v32  ;;  %v2825_v32 = vld [vmem:[#allocation7 + $0xf0] sm:$0xf] }
 0x106   :  { %1300 = vmatpush.bf16.msrb.mxu3 %v2534_v6  ;;  %v3213_v6 = vld [vmem:[#allocation6 + $0x1f0] sm:$0xf0] }
 0x107   :  { %1286 = vmatpush.bf16.msrb.mxu2 %v2438_v42  ;;  %v2666_v10 = vor.u32 %v3213_v6, %v2665_v48  ;;  %v2737_v42 = vld [vmem:[#allocation7 + $0x40] sm:$0xf]  ;;  %v2713_v48 = vld [vmem:[#allocation7 + $0x10] sm:$0xf]  ;;  %v3226_v6 = vld [vmem:[#allocation7 + $0x14] sm:$0xf0] }
 0x10a   :  { %1301 = vmatpush.bf16.msrb.mxu3 %v2522_v20 }
 0x10b   :  { %1287 = vmatpush.bf16.msrb.mxu2 %v2426_v52  ;;  %v2729_v52 = vld [vmem:[#allocation7 + $0x30] sm:$0xf] }
 0x149   :  { %v646_v60 = vpop.f32.mrf.mxu0 }
 0x14a   :  { %v660_v0 = vpop.f32.mrf.mxu1  ;;  %v647_v7 = vadd.f32 %v646_v60, %v348_v59  ;;  %v2689_v60 = vld [vmem:[#allocation6 + $0x218] sm:$0xf] }
 0x14b   :  { %v2690_v63 = vor.u32 %v3219_v61, %v2689_v60  ;;  %v2721_v61 = vld [vmem:[#allocation7 + $0x20] sm:$0xf] }
 0x14c   :  { %v661_v18 = vadd.f32 %v660_v0, %v647_v7  ;;  %v2677_v0 = vld [vmem:[#allocation6 + $0x200] sm:$0xf] }
 0x14d   :  { %v2678_v4 = vor.u32 %v3216_v1, %v2677_v0  ;;  %v3246_v1 = vld [vmem:[#allocation7 + $0xb4] sm:$0xf0] }
 0x14e   :  { %v694_v28 = vmul.f32 0.01, %v661_v18 }
 0x14f   :  { %v618_v15 = vpop.f32.mrf.mxu2 }
 0x150   :  { %v632_v19 = vpop.f32.mrf.mxu3  ;;  %v619_v24 = vadd.f32 %v618_v15, %v347_v11  ;;  %v700_v36 = vmax.f32 %v661_v18, %v694_v28  ;;  %v2641_v18 = vld [vmem:[#allocation6 + $0x1b8] sm:$0xf] }
 0x151   :  { %v648_v21 = vpop.f32.mrf.mxu0  ;;  %v3238_v28 = vld [vmem:[#allocation7 + $0x74] sm:$0xf0] }
 0x152   :  { %v649_v25 = vadd.f32 %v648_v21, %v348_v59  ;;  %v662_v27 = vpop.f32.mrf.mxu1  ;;  %v633_v33 = vadd.f32 %v632_v19, %v619_v24  ;;  %v3207_v19 = vld [vmem:[#allocation6 + $0x1c0] sm:$0xf0]  ;;  %v2629_v21 = vld [vmem:[#allocation6 + $0x1a0] sm:$0xf]  ;;  %v2617_v24 = vld [vmem:[#allocation6 + $0x188] sm:$0xf] }
 0x153   :  { %v2642_v20 = vor.u32 %v3207_v19, %v2641_v18  ;;  %v2630_v23 = vor.u32 %v3204_v22, %v2629_v21  ;;  %v3242_v18 = vld [vmem:[#allocation7 + $0x94] sm:$0xf0]  ;;  %v3229_v19 = vld [vmem:[#allocation7 + $0x34] sm:$0xf] }
 0x154   :  { %v663_v29 = vadd.f32 %v662_v27, %v649_v25  ;;  %v693_v43 = vmul.f32 0.01, %v633_v33  ;;  %v3201_v25 = vld [vmem:[#allocation6 + $0x190] sm:$0xf0]  ;;  %v2761_v27 = vld [vmem:[#allocation7 + $0x70] sm:$0xf] }
 0x155   :  { %v2618_v26 = vor.u32 %v3201_v25, %v2617_v24  ;;  %v2827_v24 = vld [vmem:[#allocation7 + $0xf8] sm:$0xf0] }
 0x156   :  { %v697_v34 = vmul.f32 0.01, %v663_v29  ;;  %v699_v53 = vmax.f32 %v633_v33, %v693_v43  ;;  %v3254_v33 = vld [vmem:[#allocation7 + $0xf4] sm:$0xf0]  ;;  %v3232_v43 = vld [vmem:[#allocation7 + $0x44] sm:$0xf0] }
 0x157   :  { %v620_v35 = vpop.f32.mrf.mxu2 }
 0x158   :  { %v703_v37 = vmax.f32 %v663_v29, %v697_v34  ;;  %v621_v38 = vadd.f32 %v620_v35, %v347_v11  ;;  %v634_v39 = vpop.f32.mrf.mxu3  ;;  %v2762_v29 = vor.u32 %v3238_v28, %v2761_v27  ;;  %v2754_v34 = vor.u32 %v3236_v31, %v2753_v30  ;;  %v3240_v27 = vld [vmem:[#allocation7 + $0x84] sm:$0xf0]  ;;  %v3270_v30 = vld [vmem:[#allocation7 + $0x174] sm:$0xf0]  ;;  %v3227_v31 = vld [vmem:[#allocation7 + $0x24] sm:$0xf] }
 0x159   :  { %v2826_v35 = vor.u32 %v3254_v33, %v2825_v32  ;;  %v2723_v33 = vld [vmem:[#allocation7 + $0x28] sm:$0xf0] }
 0x15a   :  { %v706_v44 = vpack.c.bf16 %v703_v37, %v700_v36  ;;  %v635_v45 = vadd.f32 %v634_v39, %v621_v38  ;;  %v2745_v36 = vld [vmem:[#allocation7 + $0x50] sm:$0xf]  ;;  %v3234_v37 = vld [vmem:[#allocation7 + $0x54] sm:$0xf0]  ;;  %v2817_v38 = vld [vmem:[#allocation7 + $0xe0] sm:$0xf] }
 0x15b   :  { %v2746_v39 = vor.u32 %v3234_v37, %v2745_v36  ;;  %v2818_v41 = vor.u32 %v3252_v40, %v2817_v38  ;;  %v2726_v36 = vor.u32 %v3227_v31, %v2723_v33  ;;  %v3269_v38 = vld [vmem:[#allocation7 + $0x174] sm:$0xf]  ;;  %v3259_v31 = vld [vmem:[#allocation7 + $0x124] sm:$0xf] }
 0x15c   :  { %v696_v49 = vmul.f32 0.01, %v635_v45  ;;  %1218 = vmatmul.bf16.vlgmr.msra.gmra.mxu1 %v706_v44 }
 0x15d   :  { %1631 = vmatpush.bf16.msra.mxu1 %v2762_v29  ;;  %v2889_v29 = vld [vmem:[#allocation7 + $0x170] sm:$0xf] }
 0x15e   :  { %v702_v54 = vmax.f32 %v635_v45, %v696_v49  ;;  %v2738_v45 = vor.u32 %v3232_v43, %v2737_v42  ;;  %v2763_v49 = vld [vmem:[#allocation7 + $0x78] sm:$0xf0]  ;;  %v2890_v32 = vor.u32 %v3270_v30, %v2889_v29  ;;  %v3268_v42 = vld [vmem:[#allocation7 + $0x164] sm:$0xf0]  ;;  %v3225_v43 = vld [vmem:[#allocation7 + $0x14] sm:$0xf] }
 0x15f   :  { %v674_v56 = vpop.f32.mrf.mxu2  ;;  %v2766_v51 = vor.u32 %v3237_v47, %v2763_v49  ;;  %v3249_v47 = vld [vmem:[#allocation7 + $0xd4] sm:$0xf]  ;;  %v2811_v49 = vld [vmem:[#allocation7 + $0xd8] sm:$0xf0] }
 0x160   :  { %v705_v58 = vpack.c.bf16 %v702_v54, %v699_v53  ;;  %v688_v59 = vpop.f32.mrf.mxu3  ;;  %v675_v62 = vadd.f32 %v674_v56, %v349_v55  ;;  %v3230_v53 = vld [vmem:[#allocation7 + $0x34] sm:$0xf0]  ;;  %v2801_v54 = vld [vmem:[#allocation7 + $0xc0] sm:$0xf]  ;;  %v3248_v56 = vld [vmem:[#allocation7 + $0xc4] sm:$0xf0] }
 0x161   :  { %1632 = vmatpush.bf16.msra.mxu1 %v2754_v34  ;;  %v3251_v34 = vld [vmem:[#allocation7 + $0xe4] sm:$0xf]  ;;  %v2779_v30 = vld [vmem:[#allocation7 + $0x98] sm:$0xf0] }
 0x162   :  { %1204 = vmatmul.bf16.vlgmr.msra.gmra.mxu0 %v705_v58  ;;  %1246 = vmatmul.bf16.vlgmr.msra.gmra.mxu3 %v705_v58  ;;  %v689_v2 = vadd.f32 %v688_v59, %v675_v62  ;;  %v2802_v59 = vor.u32 %v3248_v56, %v2801_v54  ;;  %v3228_v62 = vld [vmem:[#allocation7 + $0x24] sm:$0xf0]  ;;  %v2883_v54 = vld [vmem:[#allocation7 + $0x168] sm:$0xf0]  ;;  %v2873_v56 = vld [vmem:[#allocation7 + $0x150] sm:$0xf] }
 0x163   :  { %1308 = vmatpush.bf16.msra.mxu0 %v2702_v57  ;;  %v3235_v57 = vld [vmem:[#allocation7 + $0x64] sm:$0xf]  ;;  %v2722_v0 = vor.u32 %v3228_v62, %v2721_v61  ;;  %1659 = vmatpush.bf16.msra.mxu3 %v2890_v32  ;;  %v2803_v62 = vld [vmem:[#allocation7 + $0xc8] sm:$0xf0] }
 0x164   :  { %v695_v8 = vmul.f32 0.01, %v689_v2  ;;  %v3247_v61 = vld [vmem:[#allocation7 + $0xc4] sm:$0xf]  ;;  %v2851_v32 = vld [vmem:[#allocation7 + $0x128] sm:$0xf0] }
 0x165   :  { %1633 = vmatpush.bf16.msra.mxu1 %v2746_v39  ;;  %v2891_v39 = vld [vmem:[#allocation7 + $0x178] sm:$0xf0] }
 0x166   :  { %v701_v14 = vmax.f32 %v689_v2, %v695_v8  ;;  %v3233_v2 = vld [vmem:[#allocation7 + $0x54] sm:$0xf]  ;;  %v2714_v8 = vor.u32 %v3226_v6, %v2713_v48  ;;  %v2894_v40 = vor.u32 %v3269_v38, %v2891_v39  ;;  %v2841_v39 = vld [vmem:[#allocation7 + $0x110] sm:$0xf] }
 0x167   :  { %v676_v3 = vpop.f32.mrf.mxu2  ;;  %1309 = vmatpush.bf16.msra.mxu0 %v2690_v63  ;;  %v2793_v63 = vld [vmem:[#allocation7 + $0xb0] sm:$0xf]  ;;  %v3245_v48 = vld [vmem:[#allocation7 + $0xb4] sm:$0xf] }
 0x168   :  { %v677_v5 = vadd.f32 %v676_v3, %v349_v55  ;;  %v690_v7 = vpop.f32.mrf.mxu3  ;;  %v2730_v55 = vor.u32 %v3230_v53, %v2729_v52  ;;  %v2747_v3 = vld [vmem:[#allocation7 + $0x58] sm:$0xf0]  ;;  %v2814_v52 = vor.u32 %v3249_v47, %v2811_v49  ;;  %v3267_v53 = vld [vmem:[#allocation7 + $0x164] sm:$0xf] }
 0x169   :  { %1634 = vmatpush.bf16.msra.mxu1 %v2738_v45  ;;  %v2843_v47 = vld [vmem:[#allocation7 + $0x118] sm:$0xf0] }
 0x16a   :  { %v691_v9 = vadd.f32 %v690_v7, %v677_v5  ;;  %v2750_v5 = vor.u32 %v3233_v2, %v2747_v3  ;;  %v2785_v7 = vld [vmem:[#allocation7 + $0xa0] sm:$0xf]  ;;  %v2875_v2 = vld [vmem:[#allocation7 + $0x158] sm:$0xf0] }
 0x16b   :  { %1310 = vmatpush.bf16.msra.mxu0 %v2678_v4  ;;  %v2794_v4 = vor.u32 %v3246_v1, %v2793_v63  ;;  %v3265_v1 = vld [vmem:[#allocation7 + $0x154] sm:$0xf] }
 0x16c   :  { %v698_v11 = vmul.f32 0.01, %v691_v9  ;;  %v2878_v3 = vor.u32 %v3265_v1, %v2875_v2 }
 0x16d   :  { %1635 = vmatpush.bf16.msra.mxu1 %v2730_v55  ;;  %v2886_v55 = vor.u32 %v3267_v53, %v2883_v54 }
 0x16e   :  { %v704_v15 = vmax.f32 %v691_v9, %v698_v11  ;;  %v3244_v9 = vld [vmem:[#allocation7 + $0xa4] sm:$0xf0]  ;;  %v2739_v11 = vld [vmem:[#allocation7 + $0x48] sm:$0xf0] }
 0x16f   :  { %1311 = vmatpush.bf16.msra.mxu0 %v2666_v10  ;;  %v3231_v10 = vld [vmem:[#allocation7 + $0x44] sm:$0xf]  ;;  %v2786_v12 = vor.u32 %v3244_v9, %v2785_v7  ;;  %v2795_v7 = vld [vmem:[#allocation7 + $0xb8] sm:$0xf0]  ;;  %v2867_v9 = vld [vmem:[#allocation7 + $0x148] sm:$0xf0] }
 0x170   :  { %v707_v16 = vpack.c.bf16 %v704_v15, %v701_v14  ;;  %v2742_v13 = vor.u32 %v3231_v10, %v2739_v11  ;;  %v2705_v14 = vld [vmem:[#allocation7] sm:$0xf]  ;;  %v3224_v15 = vld [vmem:[#allocation7 + $0x4] sm:$0xf0]  ;;  %v2798_v11 = vor.u32 %v3245_v48, %v2795_v7 }
 0x171   :  { %1636 = vmatpush.bf16.msra.mxu1 %v2722_v0  ;;  %v2806_v0 = vor.u32 %v3247_v61, %v2803_v62  ;;  %v2835_v61 = vld [vmem:[#allocation7 + $0x108] sm:$0xf0] }
 0x172   :  { %1232 = vmatmul.bf16.vlgmr.msra.gmra.mxu2 %v707_v16  ;;  %1260 = vmatmul.bf16.vlgmr.msrb.gmra.mxu0 %v706_v44 }
 0x173   :  { %1274 = vmatmul.bf16.vlgmr.msrb.gmra.mxu1 %v707_v16  ;;  %1302 = vmatmul.bf16.vlgmr.msrb.gmra.mxu3 %v706_v44  ;;  %v2809_v44 = vld [vmem:[#allocation7 + $0xd0] sm:$0xf] }
 0x174   :  { %1312 = vmatpush.bf16.msra.mxu0 %v2654_v17  ;;  %1645 = vmatpush.bf16.msra.mxu2 %v2826_v35  ;;  %v2810_v50 = vor.u32 %v3250_v46, %v2809_v44  ;;  %v2706_v17 = vor.u32 %v3224_v15, %v2705_v14  ;;  %v2819_v35 = vld [vmem:[#allocation7 + $0xe8] sm:$0xf0]  ;;  %v2715_v46 = vld [vmem:[#allocation7 + $0x18] sm:$0xf0]  ;;  %v2857_v15 = vld [vmem:[#allocation7 + $0x130] sm:$0xf] }
 0x175   :  { %1637 = vmatpush.bf16.msra.mxu1 %v2714_v8  ;;  %v2822_v37 = vor.u32 %v3251_v34, %v2819_v35  ;;  %v3263_v8 = vld [vmem:[#allocation7 + $0x144] sm:$0xf]  ;;  %v2854_v35 = vor.u32 %v3259_v31, %v2851_v32 }
 0x178   :  { %1313 = vmatpush.bf16.msra.mxu0 %v2642_v20  ;;  %1646 = vmatpush.bf16.msra.mxu2 %v2818_v41  ;;  %v2731_v20 = vld [vmem:[#allocation7 + $0x38] sm:$0xf0]  ;;  %v2881_v41 = vld [vmem:[#allocation7 + $0x160] sm:$0xf] }
 0x179   :  { %v2734_v22 = vor.u32 %v3229_v19, %v2731_v20  ;;  %1638 = vmatpush.bf16.msra.mxu1 %v2706_v17  ;;  %v2882_v45 = vor.u32 %v3268_v42, %v2881_v41  ;;  %v3243_v17 = vld [vmem:[#allocation7 + $0xa4] sm:$0xf]  ;;  %v2787_v19 = vld [vmem:[#allocation7 + $0xa8] sm:$0xf0]  ;;  %v3261_v20 = vld [vmem:[#allocation7 + $0x134] sm:$0xf] }
 0x17a   :  { %v3239_v41 = vld [vmem:[#allocation7 + $0x84] sm:$0xf] }
 0x17b   :  { %1660 = vmatpush.bf16.msra.mxu3 %v2882_v45  ;;  %v2771_v45 = vld [vmem:[#allocation7 + $0x88] sm:$0xf0] }
 0x17c   :  { %1314 = vmatpush.bf16.msra.mxu0 %v2630_v23  ;;  %1647 = vmatpush.bf16.msra.mxu2 %v2810_v50  ;;  %v3253_v23 = vld [vmem:[#allocation7 + $0xf4] sm:$0xf] }
 0x17d   :  { %v2830_v25 = vor.u32 %v3253_v23, %v2827_v24  ;;  %v2790_v23 = vor.u32 %v3243_v17, %v2787_v19 }
 0x17f   :  { %1687 = vmatpush.bf16.msrb.mxu1 %v2830_v25 }
 0x180   :  { %1315 = vmatpush.bf16.msra.mxu0 %v2618_v26  ;;  %1648 = vmatpush.bf16.msra.mxu2 %v2802_v59  ;;  %v2769_v26 = vld [vmem:[#allocation7 + $0x80] sm:$0xf] }
 0x181   :  { %v2770_v28 = vor.u32 %v3240_v27, %v2769_v26  ;;  %v2849_v26 = vld [vmem:[#allocation7 + $0x120] sm:$0xf]  ;;  %v3260_v27 = vld [vmem:[#allocation7 + $0x124] sm:$0xf0] }
 0x182   :  { %1288 = vmatmul.bf16.vlgmr.msrb.gmra.mxu2 %v705_v58  ;;  %v2755_v58 = vld [vmem:[#allocation7 + $0x68] sm:$0xf0]  ;;  %v2850_v29 = vor.u32 %v3260_v27, %v2849_v26 }
 0x183   :  { %1316 = vmatmul.bf16.vlgmr.msra.gmra.mxu0 %v707_v16  ;;  %v2758_v60 = vor.u32 %v3235_v57, %v2755_v58  ;;  %v2777_v16 = vld [vmem:[#allocation7 + $0x90] sm:$0xf]  ;;  %1688 = vmatpush.bf16.msrb.mxu1 %v2822_v37  ;;  %v3266_v57 = vld [vmem:[#allocation7 + $0x154] sm:$0xf0]  ;;  %v3223_v58 = vld [vmem:[#allocation7 + $0x4] sm:$0xf] }
 0x184   :  { %1673 = vmatpush.bf16.msrb.mxu0 %v2766_v51  ;;  %1649 = vmatpush.bf16.msra.mxu2 %v2794_v4  ;;  %v2778_v21 = vor.u32 %v3242_v18, %v2777_v16  ;;  %v2718_v51 = vor.u32 %v3225_v43, %v2715_v46  ;;  %v2874_v59 = vor.u32 %v3266_v57, %v2873_v56  ;;  %v2865_v4 = vld [vmem:[#allocation7 + $0x140] sm:$0xf]  ;;  %v3262_v16 = vld [vmem:[#allocation7 + $0x134] sm:$0xf0]  ;;  %v3257_v46 = vld [vmem:[#allocation7 + $0x114] sm:$0xf] }
 0x185   :  { %v2858_v18 = vor.u32 %v3262_v16, %v2857_v15  ;;  %v3256_v56 = vld [vmem:[#allocation7 + $0x104] sm:$0xf0]  ;;  %v3255_v57 = vld [vmem:[#allocation7 + $0x104] sm:$0xf] }
 0x186   :  { %1661 = vmatpush.bf16.msra.mxu3 %v2874_v59 }
 0x187   :  { %1689 = vmatpush.bf16.msrb.mxu1 %v2814_v52  ;;  %v2846_v52 = vor.u32 %v3257_v46, %v2843_v47  ;;  %v2945_v47 = vld [vmem:[#allocation9 + $0x60] sm:$0xf] }
 0x188   :  { %1674 = vmatpush.bf16.msrb.mxu0 %v2758_v60  ;;  %1650 = vmatpush.bf16.msra.mxu2 %v2786_v12  ;;  %v2707_v60 = vld [vmem:[#allocation7 + $0x8] sm:$0xf0]  ;;  %v2870_v12 = vor.u32 %v3263_v8, %v2867_v9 }
 0x189   :  { %v2710_v63 = vor.u32 %v3223_v58, %v2707_v60 }
 0x18b   :  { %1690 = vmatpush.bf16.msrb.mxu1 %v2806_v0 }
 0x18c   :  { %1675 = vmatpush.bf16.msrb.mxu0 %v2750_v5  ;;  %1651 = vmatpush.bf16.msra.mxu2 %v2778_v21  ;;  %v3264_v5 = vld [vmem:[#allocation7 + $0x144] sm:$0xf0]  ;;  %v2859_v21 = vld [vmem:[#allocation7 + $0x138] sm:$0xf0] }
 0x18d   :  { %v2866_v6 = vor.u32 %v3264_v5, %v2865_v4  ;;  %v2862_v24 = vor.u32 %v3261_v20, %v2859_v21 }
 0x18f   :  { %1662 = vmatpush.bf16.msra.mxu3 %v2866_v6  ;;  %1691 = vmatpush.bf16.msrb.mxu1 %v2798_v11 }
 0x190   :  { %1676 = vmatpush.bf16.msrb.mxu0 %v2742_v13  ;;  %1652 = vmatpush.bf16.msra.mxu2 %v2770_v28  ;;  %v3241_v28 = vld [vmem:[#allocation7 + $0x94] sm:$0xf] }
 0x191   :  { %v2782_v34 = vor.u32 %v3241_v28, %v2779_v30 }
 0x193   :  { %1663 = vmatpush.bf16.msra.mxu3 %v2858_v18  ;;  %1692 = vmatpush.bf16.msrb.mxu1 %v2790_v23 }
 0x194   :  { %1677 = vmatpush.bf16.msrb.mxu0 %v2734_v22  ;;  %1701 = vmatpush.bf16.msrb.mxu2 %v2894_v40  ;;  %v3612_v22 = vld [vmem:[%s3642_s6] sm:$0x7]  ;;  %v3258_v40 = vld [vmem:[#allocation7 + $0x114] sm:$0xf0] }
 0x195   :  { %v807_v25 = vperm.slane %v3612_v22, 1  ;;  %v2842_v43 = vor.u32 %v3258_v40, %v2841_v39  ;;  %v3285_v39 = vld [vmem:[#allocation9 + $0x74] sm:$0xf]  ;;  %v2955_v40 = vld [vmem:[#allocation9 + $0x78] sm:$0xf0] }
 0x197   :  { %1664 = vmatpush.bf16.msra.mxu3 %v2850_v29  ;;  %1693 = vmatpush.bf16.msrb.mxu1 %v2782_v34  ;;  %v2953_v34 = vld [vmem:[#allocation9 + $0x70] sm:$0xf] }
 0x198   :  { %1678 = vmatpush.bf16.msrb.mxu0 %v2726_v36  ;;  %1702 = vmatpush.bf16.msrb.mxu2 %v2886_v55  ;;  %v806_v36 = vperm.slane %v3612_v22, 0  ;;  %v2833_v55 = vld [vmem:[#allocation7 + $0x100] sm:$0xf] }
 0x199   :  { %v2834_v60 = vor.u32 %v3256_v56, %v2833_v55  ;;  %v2947_v55 = vld [vmem:[#allocation9 + $0x68] sm:$0xf0] }
 0x19b   :  { %1665 = vmatpush.bf16.msra.mxu3 %v2842_v43  ;;  %v3301_v43 = vld [vmem:[#allocation9 + $0xf4] sm:$0xf] }
 0x19c   :  { %1679 = vmatpush.bf16.msrb.mxu0 %v2718_v51  ;;  %1703 = vmatpush.bf16.msrb.mxu2 %v2878_v3  ;;  %v2774_v51 = vor.u32 %v3239_v41, %v2771_v45  ;;  %v3019_v45 = vld [vmem:[#allocation9 + $0xf8] sm:$0xf0] }
 0x19d   :  { %v3022_v46 = vor.u32 %v3301_v43, %v3019_v45  ;;  %v2905_v43 = vld [vmem:[#allocation9 + $0x10] sm:$0xf]  ;;  %v3274_v45 = vld [vmem:[#allocation9 + $0x14] sm:$0xf0] }
 0x19e   :  { %1694 = vmatpush.bf16.msrb.mxu1 %v2774_v51  ;;  %v3009_v51 = vld [vmem:[#allocation9 + $0xe0] sm:$0xf] }
 0x19f   :  { %1666 = vmatpush.bf16.msra.mxu3 %v2834_v60 }
 0x1a0   :  { %1680 = vmatpush.bf16.msrb.mxu0 %v2710_v63  ;;  %1704 = vmatpush.bf16.msrb.mxu2 %v2870_v12  ;;  %v2838_v63 = vor.u32 %v3255_v57, %v2835_v61  ;;  %v2937_v61 = vld [vmem:[#allocation9 + $0x50] sm:$0xf] }
 0x1a4   :  { %1705 = vmatpush.bf16.msrb.mxu2 %v2862_v24 }
 0x1a8   :  { %1706 = vmatpush.bf16.msrb.mxu2 %v2854_v35  ;;  %v3286_v35 = vld [vmem:[#allocation9 + $0x74] sm:$0xf0] }
 0x1ac   :  { %1707 = vmatpush.bf16.msrb.mxu2 %v2846_v52 }
 0x1b0   :  { %1708 = vmatpush.bf16.msrb.mxu2 %v2838_v63  ;;  %v3001_v63 = vld [vmem:[#allocation9 + $0xd0] sm:$0xf] }
 0x1d9   :  { %v3601_v44 = vpop.f32.mrf.mxu1 }
 0x1df   :  { %v3603_v50 = vpop.f32.mrf.mxu0 }
 0x1e0   :  { %v1206_v53 = vadd.f32 %v3603_v50, %v806_v36 }
 0x1e1   :  { %v3607_v13 = vpop.f32.mrf.mxu1 }
 0x1e2   :  { %v1220_v1 = vadd.f32 %v3601_v44, %v1206_v53  ;;  %v808_v44 = vperm.slane %v3612_v22, 2  ;;  %v3300_v53 = vld [vmem:[#allocation9 + $0xe4] sm:$0xf0] }
 0x1e3   :  { %v3010_v56 = vor.u32 %v3300_v53, %v3009_v51  ;;  %v3273_v51 = vld [vmem:[#allocation9 + $0x14] sm:$0xf] }
 0x1e5   :  { %v1247_v14 = vpop.f32.mrf.mxu3 }
 0x1e6   :  { %v1248_v37 = vadd.f32 %v1247_v14, %v807_v25 }
 0x1e7   :  { %v3605_v10 = vpop.f32.mrf.mxu0 }
 0x1e8   :  { %v1208_v0 = vadd.f32 %v3605_v10, %v806_v36  ;;  %v3017_v36 = vld [vmem:[#allocation9 + $0xf0] sm:$0xf] }
 0x1ea   :  { %v1222_v6 = vadd.f32 %v3607_v13, %v1208_v0 }
 0x1ed   :  { %v1249_v49 = vpop.f32.mrf.mxu3 }
 0x1ee   :  { %v1250_v58 = vadd.f32 %v1249_v49, %v807_v25  ;;  %v3284_v49 = vld [vmem:[#allocation9 + $0x64] sm:$0xf0] }
 0x1ef   :  { %v1261_v33 = vpop.f32.mrf.mxu0  ;;  %v2946_v52 = vor.u32 %v3284_v49, %v2945_v47  ;;  %v2906_v47 = vor.u32 %v3274_v45, %v2905_v43  ;;  %v3290_v49 = vld [vmem:[#allocation9 + $0x94] sm:$0xf0]  ;;  %v3316_v43 = vld [vmem:[#allocation10 + $0x68] sm:$0xff] }
 0x1f0   :  { %v1275_v38 = vpop.f32.mrf.mxu1  ;;  %v1262_v42 = vadd.f32 %v1261_v33, %v1248_v37  ;;  %v2954_v37 = vor.u32 %v3286_v35, %v2953_v34  ;;  %v3292_v34 = vld [vmem:[#allocation9 + $0xa4] sm:$0xf0]  ;;  %v3275_v35 = vld [vmem:[#allocation9 + $0x24] sm:$0xf] }
 0x1f1   :  { %v3308_v45 = vld [vmem:[#allocation10 + $0x28] sm:$0xff] }
 0x1f2   :  { %v1276_v59 = vadd.f32 %v1275_v38, %v1262_v42  ;;  %v3302_v38 = vld [vmem:[#allocation9 + $0xf4] sm:$0xf0]  ;;  %v2958_v42 = vor.u32 %v3285_v39, %v2955_v40  ;;  %1923 = vmatpush.bf16.msrb.mxu3 %v2954_v37  ;;  %v3291_v40 = vld [vmem:[#allocation9 + $0xa4] sm:$0xf] }
 0x1f3   :  { %v3018_v41 = vor.u32 %v3302_v38, %v3017_v36  ;;  %v2915_v36 = vld [vmem:[#allocation9 + $0x28] sm:$0xf0] }
 0x1f4   :  { %v1323_v3 = vmul.f32 0.01, %v1276_v59  ;;  %v2918_v39 = vor.u32 %v3275_v35, %v2915_v36 }
 0x1f5   :  { %v1233_v54 = vpop.f32.mrf.mxu2  ;;  %1937 = vmatpush.bf16.msra.mxu0 %v3018_v41  ;;  %v2979_v41 = vld [vmem:[#allocation9 + $0xa8] sm:$0xf0] }
 0x1f6   :  { %v1234_v4 = vadd.f32 %v1233_v54, %v1220_v1  ;;  %v1329_v8 = vmax.f32 %v1276_v59, %v1323_v3  ;;  %v1303_v18 = vpop.f32.mrf.mxu3  ;;  %v3283_v54 = vld [vmem:[#allocation9 + $0x64] sm:$0xf]  ;;  %v3011_v59 = vld [vmem:[#allocation9 + $0xe8] sm:$0xf0]  ;;  %1924 = vmatpush.bf16.msrb.mxu3 %v2946_v52  ;;  %v3298_v1 = vld [vmem:[#allocation9 + $0xd4] sm:$0xf0] }
 0x1f7   :  { %v1263_v62 = vpop.f32.mrf.mxu0  ;;  %v2950_v57 = vor.u32 %v3283_v54, %v2947_v55  ;;  %v3002_v3 = vor.u32 %v3298_v1, %v3001_v63  ;;  %v2907_v52 = vld [vmem:[#allocation9 + $0x18] sm:$0xf0]  ;;  %v3289_v55 = vld [vmem:[#allocation9 + $0x94] sm:$0xf]  ;;  %v3271_v63 = vld [vmem:[#allocation9 + $0x4] sm:$0xf] }
 0x1f8   :  { %v1264_v2 = vadd.f32 %v1263_v62, %v1250_v58  ;;  %v1277_v50 = vpop.f32.mrf.mxu1  ;;  %v1322_v9 = vmul.f32 0.01, %v1234_v4  ;;  %v3299_v58 = vld [vmem:[#allocation9 + $0xe4] sm:$0xf]  ;;  %v3282_v62 = vld [vmem:[#allocation9 + $0x54] sm:$0xf0]  ;;  %v2910_v54 = vor.u32 %v3273_v51, %v2907_v52 }
 0x1f9   :  { %v3014_v60 = vor.u32 %v3299_v58, %v3011_v59  ;;  %1938 = vmatpush.bf16.msra.mxu0 %v3010_v56  ;;  %v2938_v0 = vor.u32 %v3282_v62, %v2937_v61  ;;  %v2971_v56 = vld [vmem:[#allocation9 + $0x98] sm:$0xf0]  ;;  %v2897_v58 = vld [vmem:[#allocation9] sm:$0xf]  ;;  %v3272_v59 = vld [vmem:[#allocation9 + $0x4] sm:$0xf0] }
 0x1fa   :  { %v1278_v5 = vadd.f32 %v1277_v50, %v1264_v2  ;;  %v1328_v10 = vmax.f32 %v1234_v4, %v1322_v9  ;;  %v3281_v2 = vld [vmem:[#allocation9 + $0x54] sm:$0xf]  ;;  %v2939_v50 = vld [vmem:[#allocation9 + $0x58] sm:$0xf0]  ;;  %v2993_v9 = vld [vmem:[#allocation9 + $0xc0] sm:$0xf]  ;;  %v2898_v61 = vor.u32 %v3272_v59, %v2897_v58 }
 0x1fb   :  { %v2942_v4 = vor.u32 %v3281_v2, %v2939_v50  ;;  %1925 = vmatpush.bf16.msrb.mxu3 %v2938_v0  ;;  %v3288_v62 = vld [vmem:[#allocation9 + $0x84] sm:$0xf0]  ;;  %v2899_v0 = vld [vmem:[#allocation9 + $0x8] sm:$0xf0]  ;;  %v3306_v51 = vld [vmem:[#allocation10 + $0x18] sm:$0xff] }
 0x1fc   :  { %v1326_v48 = vmul.f32 0.01, %v1278_v5  ;;  %v2902_v50 = vor.u32 %v3271_v63, %v2899_v0  ;;  %v3313_v52 = vld [vmem:[#allocation10 + $0x50] sm:$0xff]  ;;  %v1757_v59 = vld [vmem:[%s3646_s10] sm:$0x3] }
 0x1fd   :  { %v1235_v7 = vpop.f32.mrf.mxu2  ;;  %1939 = vmatpush.bf16.msra.mxu0 %v3002_v3  ;;  %v3287_v3 = vld [vmem:[#allocation9 + $0x84] sm:$0xf] }
 0x1fe   :  { %v1332_v11 = vmax.f32 %v1278_v5, %v1326_v48  ;;  %v1236_v12 = vadd.f32 %v1235_v7, %v1222_v6  ;;  %v1305_v26 = vpop.f32.mrf.mxu3  ;;  %v3297_v5 = vld [vmem:[#allocation9 + $0xd4] sm:$0xf]  ;;  %v3003_v48 = vld [vmem:[#allocation9 + $0xd8] sm:$0xf0]  ;;  %v2929_v7 = vld [vmem:[#allocation9 + $0x40] sm:$0xf] }
 0x1ff   :  { %v3006_v6 = vor.u32 %v3297_v5, %v3003_v48 }
 0x200   :  { %v1335_v14 = vpack.c.bf16 %v1332_v11, %v1329_v8  ;;  %v1325_v15 = vmul.f32 0.01, %v1236_v12  ;;  %v1317_v21 = vpop.f32.mrf.mxu0  ;;  %v3280_v8 = vld [vmem:[#allocation9 + $0x44] sm:$0xf0] }
 0x201   :  { %v2930_v11 = vor.u32 %v3280_v8, %v2929_v7  ;;  %v3310_v7 = vld [vmem:[#allocation10 + $0x38] sm:$0xff]  ;;  %v3317_v8 = vld [vmem:[#allocation10 + $0x70] sm:$0xff] }
 0x202   :  { %v1331_v16 = vmax.f32 %v1236_v12, %v1325_v15  ;;  %1653 = vmatmul.bf16.vlgmr.msra.gmra.mxu2 %v1335_v14  ;;  %v3296_v12 = vld [vmem:[#allocation9 + $0xc4] sm:$0xf0]  ;;  %v2931_v15 = vld [vmem:[#allocation9 + $0x48] sm:$0xf0] }
 0x203   :  { %1965 = vmatpush.bf16.msra.mxu2 %v3022_v46  ;;  %1926 = vmatpush.bf16.msrb.mxu3 %v2930_v11  ;;  %v2969_v46 = vld [vmem:[#allocation9 + $0x90] sm:$0xf]  ;;  %v1385_v11 = vld [vmem:[%s3644_s8] sm:$0x3] }
 0x204   :  { %v1334_v17 = vpack.c.bf16 %v1331_v16, %v1328_v10  ;;  %v2994_v10 = vor.u32 %v3296_v12, %v2993_v9  ;;  %v2970_v53 = vor.u32 %v3290_v49, %v2969_v46  ;;  %v3309_v9 = vld [vmem:[#allocation10 + $0x30] sm:$0xff]  ;;  %v3315_v46 = vld [vmem:[#allocation10 + $0x60] sm:$0xff]  ;;  %v3314_v49 = vld [vmem:[#allocation10 + $0x58] sm:$0xff] }
 0x205   :  { %v1289_v19 = vpop.f32.mrf.mxu2 }
 0x206   :  { %v1290_v20 = vadd.f32 %v1289_v19, %v808_v44  ;;  %1639 = vmatmul.bf16.vlgmr.msra.gmra.mxu1 %v1334_v17  ;;  %1681 = vmatmul.bf16.vlgmr.msrb.gmra.mxu0 %v1334_v17  ;;  %v2995_v17 = vld [vmem:[#allocation9 + $0xc8] sm:$0xf0]  ;;  %v2921_v19 = vld [vmem:[#allocation9 + $0x30] sm:$0xf] }
 0x207   :  { %1951 = vmatpush.bf16.msra.mxu1 %v2958_v42  ;;  %1966 = vmatpush.bf16.msra.mxu2 %v3014_v60  ;;  %v2982_v42 = vor.u32 %v3291_v40, %v2979_v41  ;;  %v2961_v60 = vld [vmem:[#allocation9 + $0x80] sm:$0xf] }
 0x208   :  { %v1304_v13 = vadd.f32 %v1303_v18, %v1290_v20  ;;  %v1319_v28 = vpop.f32.mrf.mxu0  ;;  %1940 = vmatpush.bf16.msra.mxu0 %v2994_v10  ;;  %v3278_v20 = vld [vmem:[#allocation9 + $0x34] sm:$0xf0]  ;;  %v2962_v2 = vor.u32 %v3288_v62, %v2961_v60  ;;  %v1387_v10 = vperm.slane %v1385_v11, 0  ;;  %v1759_v60 = vperm.slane %v1757_v59, 0 }
 0x209   :  { %v1760_v62 = vperm.slane %v1757_v59, 1 }
 0x20a   :  { %v1318_v24 = vadd.f32 %v1317_v21, %v1304_v13  ;;  %v2985_v21 = vld [vmem:[#allocation9 + $0xb0] sm:$0xf]  ;;  %v2922_v13 = vor.u32 %v3278_v20, %v2921_v19 }
 0x20b   :  { %1952 = vmatpush.bf16.msra.mxu1 %v2950_v57  ;;  %1967 = vmatpush.bf16.msra.mxu2 %v3006_v6  ;;  %v2974_v57 = vor.u32 %v3289_v55, %v2971_v56  ;;  %v3318_v6 = vld [vmem:[#allocation10 + $0x78] sm:$0xff]  ;;  %v3304_v55 = vld [vmem:[#allocation10 + $0x8] sm:$0xff]  ;;  %v3311_v56 = vld [vmem:[#allocation10 + $0x40] sm:$0xff] }
 0x20c   :  { %v1324_v29 = vmul.f32 0.01, %v1318_v24  ;;  %1927 = vmatpush.bf16.msrb.mxu3 %v2922_v13 }
 0x20d   :  { %v1291_v23 = vpop.f32.mrf.mxu2 }
 0x20e   :  { %v1292_v25 = vadd.f32 %v1291_v23, %v808_v44  ;;  %v1330_v32 = vmax.f32 %v1318_v24, %v1324_v29  ;;  %v3295_v44 = vld [vmem:[#allocation9 + $0xc4] sm:$0xf]  ;;  %v3294_v23 = vld [vmem:[#allocation9 + $0xb4] sm:$0xf0]  ;;  %v3277_v24 = vld [vmem:[#allocation9 + $0x34] sm:$0xf] }
 0x20f   :  { %1953 = vmatpush.bf16.msra.mxu1 %v2942_v4  ;;  %v2998_v18 = vor.u32 %v3295_v44, %v2995_v17  ;;  %v2987_v29 = vld [vmem:[#allocation9 + $0xb8] sm:$0xf0]  ;;  %v2963_v4 = vld [vmem:[#allocation9 + $0x88] sm:$0xf0] }
 0x210   :  { %v1306_v27 = vadd.f32 %v1305_v26, %v1292_v25  ;;  %v2923_v25 = vld [vmem:[#allocation9 + $0x38] sm:$0xf0]  ;;  %v2986_v26 = vor.u32 %v3294_v23, %v2985_v21  ;;  %v2966_v5 = vor.u32 %v3287_v3, %v2963_v4 }
 0x211   :  { %1968 = vmatpush.bf16.msra.mxu2 %v2998_v18 }
 0x212   :  { %v1320_v30 = vadd.f32 %v1319_v28, %v1306_v27  ;;  %v2926_v27 = vor.u32 %v3277_v24, %v2923_v25  ;;  %v3293_v28 = vld [vmem:[#allocation9 + $0xb4] sm:$0xf]  ;;  %1941 = vmatpush.bf16.msra.mxu0 %v2986_v26 }
 0x214   :  { %v1327_v31 = vmul.f32 0.01, %v1320_v30 }
 0x216   :  { %v1333_v33 = vmax.f32 %v1320_v30, %v1327_v31  ;;  %1695 = vmatmul.bf16.vlgmr.msrb.gmra.mxu1 %v1335_v14  ;;  %v3279_v14 = vld [vmem:[#allocation9 + $0x44] sm:$0xf]  ;;  %v2990_v30 = vor.u32 %v3293_v28, %v2987_v29  ;;  %v2913_v31 = vld [vmem:[#allocation9 + $0x20] sm:$0xf] }
 0x217   :  { %v2934_v16 = vor.u32 %v3279_v14, %v2931_v15 }
 0x218   :  { %v1336_v22 = vpack.c.bf16 %v1333_v33, %v1330_v32  ;;  %v3276_v32 = vld [vmem:[#allocation9 + $0x24] sm:$0xf0]  ;;  %v2977_v33 = vld [vmem:[#allocation9 + $0xa0] sm:$0xf]  ;;  %1969 = vmatpush.bf16.msra.mxu2 %v2990_v30 }
 0x219   :  { %1954 = vmatpush.bf16.msra.mxu1 %v2934_v16  ;;  %v2978_v38 = vor.u32 %v3292_v34, %v2977_v33  ;;  %v1388_v16 = vperm.slane %v1385_v11, 1 }
 0x21a   :  { %1667 = vmatmul.bf16.vlgmr.msra.gmra.mxu3 %v1336_v22  ;;  %1709 = vmatmul.bf16.vlgmr.msrb.gmra.mxu2 %v1336_v22  ;;  %v2914_v22 = vor.u32 %v3276_v32, %v2913_v31 }
 0x21b   :  { %1942 = vmatpush.bf16.msra.mxu0 %v2978_v38 }
 0x21c   :  { %1928 = vmatpush.bf16.msrb.mxu3 %v2914_v22  ;;  %1970 = vmatpush.bf16.msra.mxu2 %v2982_v42 }
 0x21d   :  { %1955 = vmatpush.bf16.msra.mxu1 %v2926_v27 }
 0x21f   :  { %1943 = vmatpush.bf16.msra.mxu0 %v2970_v53  ;;  %v3305_v53 = vld [vmem:[#allocation10 + $0x10] sm:$0xff] }
 0x220   :  { %1929 = vmatpush.bf16.msrb.mxu3 %v2906_v47  ;;  %1971 = vmatpush.bf16.msra.mxu2 %v2974_v57  ;;  %v3307_v47 = vld [vmem:[#allocation10 + $0x20] sm:$0xff] }
 0x221   :  { %1956 = vmatpush.bf16.msra.mxu1 %v2918_v39  ;;  %v3303_v57 = vld [vmem:[#allocation10] sm:$0xff] }
 0x223   :  { %1944 = vmatpush.bf16.msra.mxu0 %v2962_v2 }
 0x224   :  { %1930 = vmatpush.bf16.msrb.mxu3 %v2898_v61  ;;  %1972 = vmatpush.bf16.msra.mxu2 %v2966_v5 }
 0x225   :  { %1957 = vmatpush.bf16.msra.mxu1 %v2910_v54  ;;  %v3312_v54 = vld [vmem:[#allocation10 + $0x48] sm:$0xff] }
 0x227   :  { %2135 = vmatpush.bf16.msrb.mxu0 %v3318_v6 }
 0x228   :  { %2121 = vmatpush.bf16.msra.mxu3 %v3310_v7 }
 0x229   :  { %1958 = vmatpush.bf16.msra.mxu1 %v2902_v50 }
 0x22b   :  { %2136 = vmatpush.bf16.msrb.mxu0 %v3317_v8 }
 0x22c   :  { %2122 = vmatpush.bf16.msra.mxu3 %v3309_v9 }
 0x22f   :  { %2137 = vmatpush.bf16.msrb.mxu0 %v3316_v43 }
 0x230   :  { %2123 = vmatpush.bf16.msra.mxu3 %v3308_v45 }
 0x233   :  { %2138 = vmatpush.bf16.msrb.mxu0 %v3315_v46 }
 0x234   :  { %2124 = vmatpush.bf16.msra.mxu3 %v3307_v47 }
 0x237   :  { %2139 = vmatpush.bf16.msrb.mxu0 %v3314_v49 }
 0x238   :  { %2125 = vmatpush.bf16.msra.mxu3 %v3306_v51 }
 0x23b   :  { %2140 = vmatpush.bf16.msrb.mxu0 %v3313_v52 }
 0x23c   :  { %2126 = vmatpush.bf16.msra.mxu3 %v3305_v53 }
 0x23f   :  { %2141 = vmatpush.bf16.msrb.mxu0 %v3312_v54 }
 0x240   :  { %2127 = vmatpush.bf16.msra.mxu3 %v3304_v55 }
 0x243   :  { %2142 = vmatpush.bf16.msrb.mxu0 %v3311_v56 }
 0x244   :  { %2128 = vmatpush.bf16.msra.mxu3 %v3303_v57 }
 0x283   :  { %v1640_v37 = vpop.f32.mrf.mxu1  ;;  %v1682_v12 = vpop.f32.mrf.mxu0 }
 0x284   :  { %v1641_v44 = vadd.f32 %v1640_v37, %v1387_v10  ;;  %v1683_v19 = vadd.f32 %v1682_v12, %v1388_v16 }
 0x285   :  { %v1654_v1 = vpop.f32.mrf.mxu2 }
 0x286   :  { %v1655_v21 = vadd.f32 %v1654_v1, %v1641_v44 }
 0x28b   :  { %v1642_v48 = vpop.f32.mrf.mxu1  ;;  %v1684_v20 = vpop.f32.mrf.mxu0 }
 0x28c   :  { %v1643_v13 = vadd.f32 %v1642_v48, %v1387_v10  ;;  %v1685_v25 = vadd.f32 %v1684_v20, %v1388_v16 }
 0x28d   :  { %v1656_v14 = vpop.f32.mrf.mxu2 }
 0x28e   :  { %v1657_v28 = vadd.f32 %v1656_v14, %v1643_v13 }
 0x293   :  { %v1696_v15 = vpop.f32.mrf.mxu1 }
 0x294   :  { %v1697_v23 = vadd.f32 %v1696_v15, %v1683_v19 }
 0x29b   :  { %v1698_v24 = vpop.f32.mrf.mxu1 }
 0x29c   :  { %v1699_v29 = vadd.f32 %v1698_v24, %v1685_v25 }
 0x29d   :  { %v1668_v17 = vpop.f32.mrf.mxu3  ;;  %v1710_v18 = vpop.f32.mrf.mxu2 }
 0x29e   :  { %v1669_v26 = vadd.f32 %v1668_v17, %v1655_v21  ;;  %v1711_v27 = vadd.f32 %v1710_v18, %v1697_v23  ;;  %v3331_v21 = vld [vmem:[%s3648_s12] ss:$0 sm:$0xff] }
 0x2a0   :  { %v1715_v32 = vmul.f32 0.01, %v1669_v26  ;;  %v1716_v33 = vmul.f32 0.01, %v1711_v27 }
 0x2a2   :  { %v1719_v37 = vmax.f32 %v1669_v26, %v1715_v32  ;;  %v1720_v38 = vmax.f32 %v1711_v27, %v1716_v33 }
 0x2a5   :  { %v1670_v30 = vpop.f32.mrf.mxu3  ;;  %v1712_v31 = vpop.f32.mrf.mxu2 }
 0x2a6   :  { %v1671_v22 = vadd.f32 %v1670_v30, %v1657_v28  ;;  %v1713_v34 = vadd.f32 %v1712_v31, %v1699_v29 }
 0x2a8   :  { %v1717_v35 = vmul.f32 0.01, %v1671_v22  ;;  %v1718_v36 = vmul.f32 0.01, %v1713_v34 }
 0x2aa   :  { %v1721_v39 = vmax.f32 %v1671_v22, %v1717_v35  ;;  %v1722_v40 = vmax.f32 %v1713_v34, %v1718_v36 }
 0x2ac   :  { %v1723_v41 = vpack.c.bf16 %v1721_v39, %v1719_v37  ;;  %v1724_v42 = vpack.c.bf16 %v1722_v40, %v1720_v38 }
 0x2ae   :  { %1931 = vmatmul.bf16.vlgmr.msrb.gmra.mxu3 %v1723_v41  ;;  %1945 = vmatmul.bf16.vlgmr.msra.gmra.mxu0 %v1724_v42 }
 0x2af   :  { %1959 = vmatmul.bf16.vlgmr.msra.gmra.mxu1 %v1723_v41  ;;  %1973 = vmatmul.bf16.vlgmr.msra.gmra.mxu2 %v1724_v42 }
 0x32b   :  { %v1946_v61 = vpop.f32.mrf.mxu0 }
 0x32c   :  { %v1960_v58 = vpop.f32.mrf.mxu1 }
 0x32d   :  { %v1961_v2 = vadd.f32 %v1960_v58, %v1760_v62 }
 0x331   :  { %v1932_v63 = vpop.f32.mrf.mxu3 }
 0x332   :  { %v1974_v0 = vpop.f32.mrf.mxu2  ;;  %v1933_v1 = vadd.f32 %v1932_v63, %v1759_v60 }
 0x333   :  { %v1975_v3 = vadd.f32 %v1974_v0, %v1961_v2  ;;  %v1948_v9 = vpop.f32.mrf.mxu0 }
 0x334   :  { %v1962_v50 = vpop.f32.mrf.mxu1  ;;  %v1947_v4 = vadd.f32 %v1946_v61, %v1933_v1 }
 0x335   :  { %v1963_v5 = vadd.f32 %v1962_v50, %v1760_v62  ;;  %v1980_v8 = vmul.f32 0.01, %v1975_v3 }
 0x336   :  { %v1979_v12 = vmul.f32 0.01, %v1947_v4 }
 0x337   :  { %v1984_v16 = vmax.f32 %v1975_v3, %v1980_v8 }
 0x338   :  { %v1983_v17 = vmax.f32 %v1947_v4, %v1979_v12 }
 0x339   :  { %v1934_v48 = vpop.f32.mrf.mxu3 }
 0x33a   :  { %v1935_v6 = vadd.f32 %v1934_v48, %v1759_v60  ;;  %v1976_v7 = vpop.f32.mrf.mxu2 }
 0x33b   :  { %v1977_v11 = vadd.f32 %v1976_v7, %v1963_v5 }
 0x33c   :  { %v1949_v14 = vadd.f32 %v1948_v9, %v1935_v6 }
 0x33d   :  { %v1982_v15 = vmul.f32 0.01, %v1977_v11 }
 0x33e   :  { %v1981_v10 = vmul.f32 0.01, %v1949_v14 }
 0x33f   :  { %v1986_v44 = vmax.f32 %v1977_v11, %v1982_v15 }
 0x340   :  { %v1985_v18 = vmax.f32 %v1949_v14, %v1981_v10 }
 0x341   :  { %v1988_v19 = vpack.c.bf16 %v1986_v44, %v1984_v16 }
 0x342   :  { %v1987_v20 = vpack.c.bf16 %v1985_v18, %v1983_v17 }
 0x343   :  { %2143 = vmatmul.bf16.vlgmr.msrb.gmra.mxu0 %v1988_v19 }
 0x344   :  { %2129 = vmatmul.bf16.vlgmr.msra.gmra.mxu3 %v1987_v20 }
 0x3c0   :  { %v2144_v13 = vpop.f32.mrf.mxu0 }
 0x3c7   :  { %v2130_v23 = vpop.f32.mrf.mxu3 }
 0x3c8   :  { %v2131_v24 = vadd.f32 %v3331_v21, %v2130_v23  ;;  %v2146_v28 = vpop.f32.mrf.mxu0 }
 0x3ca   :  { %v2145_v25 = vadd.f32 %v2144_v13, %v2131_v24 }
 0x3cc   :  { %2149 = vst [vmem:[%s3649_s13] sm:$0xff] %v2145_v25 }
 0x3cf   :  { %v2132_v26 = vpop.f32.mrf.mxu3 }
 0x3d0   :  { %v2133_v27 = vadd.f32 %v3331_v21, %v2132_v26 }
 0x3d2   :  { %v2147_v29 = vadd.f32 %v2146_v28, %v2133_v27 }
 0x3d4   :  { %2150 = vst [vmem:[%s3649_s13 + $0x8] sm:$0xff] %v2147_v29 }
 0x3d5   :  { %2155 = vsyncpa [#allocation3], 1 }
 0x3d6   :  { %2156 = vsyncpa [#allocation5], 1 }
 0x3d7   :  { %2157 = vsyncpa [#allocation8], 1 }
 0x3d8   :  { %2158 = vsyncpa [#allocation11], 1 }

</bundles_post_ra>
